<compile_context>
chip_gen: v7x
topology: tpu7x:2x2x1
jax: 0.10.0
libtpu: 0.0.40
codegen_flags: <defaults>
</compile_context>

<pallas_src>
import math
import jax
import jax.numpy as jnp
from jax.experimental import pallas as pl
from jax.experimental.pallas import tpu as pltpu  # noqa: F401  (TPU backend)

# ---- small hyperparameters consistent with the module's config ----
BATCH = 2
DECODER_DIM = 32          # decoder_dim (input txt_embed feature dim)
TXT_TOKENS = 8            # txt_tokens
TXT_LENGTH = 16           # text_length
VOCAB = 64                # text_config.vocab_size
HEADS = 4                 # decoder_heads
HEAD_DIM = DECODER_DIM // HEADS
MLP_DIM = 64              # transformer feed-forward dim
DEPTH = 2                 # decoder_depth
LN_EPS = 1e-5
BN_EPS = 1e-5

# ---- packed-slab row layout (all rows are 128 f32 lanes wide) ----
ROW_FRONT = 0                                   # 16 rows: conv2_w, folded conv1 w/b
ROW_POS = ROW_FRONT + TXT_LENGTH                # 32 rows: pos emb (conv2 bias folded)
ROW_WORDS = ROW_POS + BATCH * TXT_LENGTH        # 40 rows: to_words weight + bias
ROW_NEG = ROW_WORDS + 40                        # 32 rows: cross-batch -1e30 mask
ROW_BLKT = ROW_NEG + BATCH * TXT_LENGTH         # 32 rows: head mask, (D, B*H*L)
ROW_BLK2 = ROW_BLKT + DECODER_DIM               # 128 rows: [blk | blk], (B*H*L, 2D)
ROW_LAYERS = ROW_BLK2 + BATCH * HEADS * TXT_LENGTH
LAYER_ROWS = 96                                 # per-layer weights + biases
SLAB_ROWS = ROW_LAYERS + DEPTH * LAYER_ROWS     # 472


def _layernorm(x, g, b):
    mu = jnp.mean(x, axis=-1, keepdims=True)
    var = jnp.mean((x - mu) ** 2, axis=-1, keepdims=True)
    return (x - mu) * jax.lax.rsqrt(var + LN_EPS) * g + b


def txt_decoder_kernel(x_ref, slab_ref, out_ref):
    D, L, T, B, H, M, V = (DECODER_DIM, TXT_LENGTH, TXT_TOKENS, BATCH, HEADS,
                           MLP_DIM, VOCAB)
    BL, BHL = B * L, B * H * L

    # ---- dim_to_tokens: Conv1d(1->T,k=1) [BN folded] -> ReLU -> Conv1d(T->L,k=1)
    x = x_ref[...]                                            # (1, B*D), batch on lanes
    c2 = slab_ref[ROW_FRONT:ROW_FRONT + L, 0:T]               # (L, T)
    w1 = slab_ref[ROW_FRONT:ROW_FRONT + T, T:T + 1]           # (T, 1)  BN-folded weight
    b1 = slab_ref[ROW_FRONT:ROW_FRONT + T, T + 1:T + 2]       # (T, 1)  BN-folded bias
    h = jnp.maximum(w1 * x + b1, 0.0)                         # (T, B*D)
    tok = jnp.dot(c2, h, preferred_element_type=jnp.float32)  # (L, B*D)
    # regroup lanes (batch) onto sublanes: z[b*L + l, d] = tok[l, b*D + d]
    z = jnp.concatenate([tok[:, b * D:(b + 1) * D] for b in range(B)], axis=0)
    z = z + slab_ref[ROW_POS:ROW_POS + BL, 0:D]               # conv2 bias folded into pos

    # ---- precomputed block-diagonal masks (DMA'd with the slab, no iota work) ----
    neg_inf = slab_ref[ROW_NEG:ROW_NEG + BL, :]               # (BL, BHL)  0 / -1e30
    blkT = slab_ref[ROW_BLKT:ROW_BLKT + D, :]                 # (D, BHL)   head mask
    blk2 = slab_ref[ROW_BLK2:ROW_BLK2 + BHL, 0:2 * D]         # (BHL, 2D)  [blk | blk]
    ones_half = jnp.ones((BL, D), jnp.float32)

    for layer in range(DEPTH):
        base = ROW_LAYERS + layer * LAYER_ROWS
        wqkv = slab_ref[base:base + D, 0:3 * D]               # (D, 3D)  Q pre-scaled
        wo = slab_ref[base:base + D, 3 * D:4 * D]             # (D, D)
        wff1 = slab_ref[base + D:base + 2 * D, 0:M]           # (D, M)
        wff2 = slab_ref[base + D:base + D + M, 3 * D:4 * D]   # (M, D) natural orientation
        r_b = base + 2 * D
        bqkv = slab_ref[r_b:r_b + 1, 0:3 * D]
        bo = slab_ref[r_b + 1:r_b + 2, 0:D]
        g1 = slab_ref[r_b + 1:r_b + 2, D:2 * D]
        e1 = slab_ref[r_b + 1:r_b + 2, 2 * D:3 * D]
        bff1 = slab_ref[r_b + 2:r_b + 3, 0:M]
        bff2 = slab_ref[r_b + 3:r_b + 4, 0:D]
        g2 = slab_ref[r_b + 3:r_b + 4, D:2 * D]
        e2 = slab_ref[r_b + 3:r_b + 4, 2 * D:3 * D]

        # ---- self attention: all batches & heads fused via block-diagonal K/V ----
        qkv = jnp.dot(z, wqkv, preferred_element_type=jnp.float32) + bqkv   # (BL, 3D)
        q = qkv[:, 0:D]                # 1/sqrt(HD) already folded into wq/bq
        k = qkv[:, D:2 * D]
        v = qkv[:, 2 * D:3 * D]
        # lane-major block-diagonal K^T: (D, BHL), dense 128-lane rows
        kT = jnp.transpose(k)                                               # (D, BL)
        k_bdT = jnp.concatenate([kT] * H, axis=1) * blkT                    # (D, BHL)
        s = jnp.dot(q, k_bdT, preferred_element_type=jnp.float32) + neg_inf # (BL, BHL)
        s = s - jnp.max(s, axis=-1, keepdims=True)   # global row max (see header note)
        p = jnp.exp(s)                               # cross-batch entries -> 0
        # fused context + denominator matmul: RHS = [v_bd | blk], (BHL, 2D)
        rhs = jnp.concatenate([jnp.concatenate([v, ones_half], axis=1)] * H,
                              axis=0) * blk2
        r = jnp.dot(p, rhs, preferred_element_type=jnp.float32)             # (BL, 2D)
        ctx = r[:, 0:D] * pl.reciprocal(jnp.maximum(r[:, D:2 * D], 1e-20),
                                        approx=True)
        attn = jnp.dot(ctx, wo, preferred_element_type=jnp.float32) + bo
        z = _layernorm(z + attn, g1, e1)

        # ---- feed forward (exact erf GELU, as in PyTorch 'gelu') ----
        ff = jnp.dot(z, wff1, preferred_element_type=jnp.float32) + bff1
        ff = 0.5 * ff * (1.0 + jax.lax.erf(ff * (1.0 / math.sqrt(2.0))))
        y = jnp.dot(ff, wff2, preferred_element_type=jnp.float32) + bff2
        z = _layernorm(z + y, g2, e2)

    # ---- to_words, emitted lane-dense as (L, B*V) = (16, 128) ----
    ww = slab_ref[ROW_WORDS:ROW_WORDS + D, 0:V]
    bw = slab_ref[ROW_WORDS + D:ROW_WORDS + D + 1, 0:V]
    logits = jnp.dot(z, ww, preferred_element_type=jnp.float32) + bw        # (BL, V)
    out_ref[...] = jnp.concatenate(
        [logits[b * L:(b + 1) * L, :] for b in range(B)], axis=1)


def pack_params(p):
    """Fold BN / conv2-bias / softmax scale and pack everything into one slab."""
    D, L, T, B, H, HD, M, V = (DECODER_DIM, TXT_LENGTH, TXT_TOKENS, BATCH,
                               HEADS, HEAD_DIM, MLP_DIM, VOCAB)
    BL, BHL = B * L, B * H * L

    # eval-mode BatchNorm folded into conv1
    s_bn = p["bn_g"] * jax.lax.rsqrt(p["bn_rv"] + BN_EPS)           # (T, 1)
    w1f = p["conv1_w"] * s_bn
    b1f = (p["conv1_b"] - p["bn_rm"]) * s_bn + p["bn_b"]

    # conv2 bias folded into the positional embedding, tiled per batch row
    pos_all = jnp.tile(p["pos"] + p["conv2_b"], (B, 1))             # (B*L, D)

    # 1/sqrt(head_dim) folded into the Q columns of the qkv projection
    scale = 1.0 / math.sqrt(HD)
    qcol = jnp.concatenate([jnp.full((D,), scale, jnp.float32),
                            jnp.ones((2 * D,), jnp.float32)])
    wqkv_s = p["wqkv"] * qcol[None, None, :]
    bqkv_s = p["bqkv"] * qcol[None, None, :]

    # precomputed block-diagonal attention masks
    col = jnp.arange(BHL)
    row_q = jnp.arange(BL)
    d_idx = jnp.arange(D)
    neg = jnp.where((col[None, :] // L) % B == row_q[:, None] // L,
                    0.0, -1e30).astype(jnp.float32)                 # (BL, BHL)
    blkT = (d_idx[:, None] // HD == col[None, :] // BL).astype(jnp.float32)  # (D, BHL)
    blk = (col[:, None] // BL == d_idx[None, :] // HD).astype(jnp.float32)   # (BHL, D)
    blk2 = jnp.concatenate([blk, blk], axis=1)                      # (BHL, 2D)

    slab = jnp.zeros((SLAB_ROWS, 128), jnp.float32)
    slab = slab.at[ROW_FRONT:ROW_FRONT + L, 0:T].set(p["conv2_w"])
    slab = slab.at[ROW_FRONT:ROW_FRONT + T, T:T + 1].set(w1f)
    slab = slab.at[ROW_FRONT:ROW_FRONT + T, T + 1:T + 2].set(b1f)
    slab = slab.at[ROW_POS:ROW_POS + BL, 0:D].set(pos_all)
    slab = slab.at[ROW_WORDS:ROW_WORDS + D, 0:V].set(p["ww"])
    slab = slab.at[ROW_WORDS + D, 0:V].set(p["bw"][0])
    slab = slab.at[ROW_NEG:ROW_NEG + BL, :].set(neg)
    slab = slab.at[ROW_BLKT:ROW_BLKT + D, :].set(blkT)
    slab = slab.at[ROW_BLK2:ROW_BLK2 + BHL, 0:2 * D].set(blk2)

    for l in range(DEPTH):
        base = ROW_LAYERS + l * LAYER_ROWS
        slab = slab.at[base:base + D, 0:3 * D].set(wqkv_s[l])
        slab = slab.at[base:base + D, 3 * D:4 * D].set(p["wo"][l])
        slab = slab.at[base + D:base + 2 * D, 0:M].set(p["wff1"][l])
        slab = slab.at[base + D:base + D + M, 3 * D:4 * D].set(p["wff2"][l])
        r_b = base + 2 * D
        slab = slab.at[r_b, 0:3 * D].set(bqkv_s[l, 0])
        slab = slab.at[r_b + 1, 0:D].set(p["bo"][l, 0])
        slab = slab.at[r_b + 1, D:2 * D].set(p["ln1_g"][l, 0])
        slab = slab.at[r_b + 1, 2 * D:3 * D].set(p["ln1_b"][l, 0])
        slab = slab.at[r_b + 2, 0:M].set(p["bff1"][l, 0])
        slab = slab.at[r_b + 3, 0:D].set(p["bff2"][l, 0])
        slab = slab.at[r_b + 3, D:2 * D].set(p["ln2_g"][l, 0])
        slab = slab.at[r_b + 3, 2 * D:3 * D].set(p["ln2_b"][l, 0])
    return slab


def txt_decoder_forward(txt_embed, slab):
    """txt_embed: (B, 1, decoder_dim) -> (B, txt_length, vocab_size)."""
    B = txt_embed.shape[0]
    assert B == BATCH, "kernel is specialised to the module's batch size"
    x_in = txt_embed.reshape(1, B * DECODER_DIM)     # batch flattened onto lanes
    out = pl.pallas_call(
        txt_decoder_kernel,
        out_shape=jax.ShapeDtypeStruct((TXT_LENGTH, B * VOCAB), jnp.float32),
    )(x_in, slab)
    # lane-dense (L, B*V) -> (B, L, V)
    return out.reshape(TXT_LENGTH, B, VOCAB).transpose(1, 0, 2)


def init_params(key):
    keys = iter(jax.random.split(key, 32))

    def nrm(shape, scale=0.05):
        return (scale * jax.random.normal(next(keys), shape)).astype(jnp.float32)

    p = {}
    # dim_to_tokens: Conv1d(1, T, 1) -> BN(T) -> ReLU -> Conv1d(T, L, 1)
    p["conv1_w"] = nrm((TXT_TOKENS, 1), 0.2)
    p["conv1_b"] = nrm((TXT_TOKENS, 1), 0.1)
    p["bn_g"] = 1.0 + nrm((TXT_TOKENS, 1), 0.1)
    p["bn_b"] = nrm((TXT_TOKENS, 1), 0.1)
    p["bn_rm"] = nrm((TXT_TOKENS, 1), 0.1)
    p["bn_rv"] = 1.0 + jnp.abs(nrm((TXT_TOKENS, 1), 0.1))
    p["conv2_w"] = nrm((TXT_LENGTH, TXT_TOKENS), 0.2)
    p["conv2_b"] = nrm((TXT_LENGTH, 1), 0.1)
    p["pos"] = nrm((TXT_LENGTH, DECODER_DIM), 0.2)
    # transformer layers (weights stored pre-transposed: (in, out))
    p["wqkv"] = nrm((DEPTH, DECODER_DIM, 3 * DECODER_DIM), 0.1)
    p["bqkv"] = nrm((DEPTH, 1, 3 * DECODER_DIM), 0.05)
    p["wo"] = nrm((DEPTH, DECODER_DIM, DECODER_DIM), 0.1)
    p["bo"] = nrm((DEPTH, 1, DECODER_DIM), 0.05)
    p["ln1_g"] = 1.0 + nrm((DEPTH, 1, DECODER_DIM), 0.05)
    p["ln1_b"] = nrm((DEPTH, 1, DECODER_DIM), 0.05)
    p["wff1"] = nrm((DEPTH, DECODER_DIM, MLP_DIM), 0.1)
    p["bff1"] = nrm((DEPTH, 1, MLP_DIM), 0.05)
    p["wff2"] = nrm((DEPTH, MLP_DIM, DECODER_DIM), 0.1)
    p["bff2"] = nrm((DEPTH, 1, DECODER_DIM), 0.05)
    p["ln2_g"] = 1.0 + nrm((DEPTH, 1, DECODER_DIM), 0.05)
    p["ln2_b"] = nrm((DEPTH, 1, DECODER_DIM), 0.05)
    # to_words: Linear(D, V) with bias tied to nn.Parameter(zeros(V))
    p["ww"] = nrm((DECODER_DIM, VOCAB), 0.1)
    p["bw"] = jnp.zeros((1, VOCAB), jnp.float32)
    return p


def reference_forward(x, p):
    """Pure-JAX reference of the same forward (for a sanity check)."""
    with jax.default_matmul_precision("highest"):
        B = x.shape[0]
        xb = x[:, 0, :]
        h = p["conv1_w"][None] * xb[:, None, :] + p["conv1_b"][None]
        h = (h - p["bn_rm"][None]) * jax.lax.rsqrt(p["bn_rv"][None] + BN_EPS)
        h = h * p["bn_g"][None] + p["bn_b"][None]
        h = jnp.maximum(h, 0.0)
        tok = jnp.einsum("lt,btd->bld", p["conv2_w"], h) + p["conv2_b"][None]
        z = tok + p["pos"][None]
        for l in range(DEPTH):
            qkv = z @ p["wqkv"][l] + p["bqkv"][l]
            q, k, v = jnp.split(qkv, 3, axis=-1)

            def to_heads(t):
                return t.reshape(B, TXT_LENGTH, HEADS, HEAD_DIM).transpose(0, 2, 1, 3)

            q, k, v = to_heads(q), to_heads(k), to_heads(v)
            s = jnp.einsum("bhld,bhmd->bhlm", q, k) / math.sqrt(HEAD_DIM)
            a = jax.nn.softmax(s, axis=-1)
            o = jnp.einsum("bhlm,bhmd->bhld", a, v)
            o = o.transpose(0, 2, 1, 3).reshape(B, TXT_LENGTH, DECODER_DIM)
            attn = o @ p["wo"][l] + p["bo"][l]
            z = _layernorm(z + attn, p["ln1_g"][l], p["ln1_b"][l])
            ff = z @ p["wff1"][l] + p["bff1"][l]
            ff = 0.5 * ff * (1.0 + jax.lax.erf(ff / math.sqrt(2.0)))
            ff = ff @ p["wff2"][l] + p["bff2"][l]
            z = _layernorm(z + ff, p["ln2_g"][l], p["ln2_b"][l])
        return z @ p["ww"] + p["bw"]


if __name__ == "__main__":
    key = jax.random.PRNGKey(0)
    kx, kp = jax.random.split(key)
    x = jax.random.normal(kx, (BATCH, 1, DECODER_DIM), dtype=jnp.float32)
    params = init_params(kp)
    slab = pack_params(params)

    out = txt_decoder_forward(x, slab)
    out = jax.block_until_ready(out)
    assert out.shape == (BATCH, TXT_LENGTH, VOCAB)

    ref = reference_forward(x, params)
    err = float(jnp.max(jnp.abs(out - ref)))
    assert err < 2e-2, f"mismatch vs reference, max abs err = {err}"
    print("KERNEL_OK")
</pallas_src>

<mosaic_0001>
module attributes {stable_mosaic.version = 11 : i64} {
  func.func @txt_decoder_kernel(%arg0: memref<1x64xf32, #tpu.memory_space<vmem>>, %arg1: memref<472x128xf32, #tpu.memory_space<vmem>>, %arg2: memref<16x128xf32, #tpu.memory_space<vmem>>) attributes {dimension_semantics = [], scalar_prefetch = 0 : i64, scratch_operands = 0 : i64, tpu.core_type = #tpu.core_type<tc>} {
    %c0 = arith.constant 0 : index
    %c0_0 = arith.constant 0 : index
    %0 = vector.load %arg0[%c0, %c0_0] : memref<1x64xf32, #tpu.memory_space<vmem>>, vector<1x64xf32>
    %c0_1 = arith.constant 0 : index
    %c0_2 = arith.constant 0 : index
    %1 = vector.load %arg1[%c0_1, %c0_2] : memref<472x128xf32, #tpu.memory_space<vmem>>, vector<16x8xf32>
    %c0_3 = arith.constant 0 : index
    %c8 = arith.constant 8 : index
    %2 = vector.load %arg1[%c0_3, %c8] : memref<472x128xf32, #tpu.memory_space<vmem>>, vector<8x1xf32>
    %c0_4 = arith.constant 0 : index
    %c9 = arith.constant 9 : index
    %3 = vector.load %arg1[%c0_4, %c9] : memref<472x128xf32, #tpu.memory_space<vmem>>, vector<8x1xf32>
    %4 = vector.broadcast %2 : vector<8x1xf32> to vector<8x64xf32>
    %5 = vector.broadcast %0 : vector<1x64xf32> to vector<8x64xf32>
    %6 = arith.mulf %4, %5 : vector<8x64xf32>
    %7 = vector.broadcast %3 : vector<8x1xf32> to vector<8x64xf32>
    %8 = arith.addf %6, %7 : vector<8x64xf32>
    %cst = arith.constant 0.000000e+00 : f32
    %9 = vector.broadcast %cst : f32 to vector<8x64xf32>
    %10 = arith.maximumf %8, %9 : vector<8x64xf32>
    %cst_5 = arith.constant dense<0.000000e+00> : vector<16x64xf32>
    %11 = tpu.matmul %1, %10, %cst_5 {dimension_numbers = #tpu.dot_dimension_numbers<[1], [0], [0], [1], [0, 0, 1, 1], [], []>} : vector<16x8xf32>, vector<8x64xf32>, vector<16x64xf32> -> vector<16x64xf32>
    %12 = vector.extract_strided_slice %11 {offsets = [0, 0], sizes = [16, 32], strides = [1, 1]} : vector<16x64xf32> to vector<16x32xf32>
    %13 = vector.extract_strided_slice %11 {offsets = [0, 32], sizes = [16, 32], strides = [1, 1]} : vector<16x64xf32> to vector<16x32xf32>
    %14 = tpu.concatenate %12, %13 in 0 : vector<16x32xf32>, vector<16x32xf32> -> vector<32x32xf32>
    %c16 = arith.constant 16 : index
    %c0_6 = arith.constant 0 : index
    %15 = vector.load %arg1[%c16, %c0_6] : memref<472x128xf32, #tpu.memory_space<vmem>>, vector<32x32xf32>
    %16 = arith.addf %14, %15 : vector<32x32xf32>
    %c88 = arith.constant 88 : index
    %c0_7 = arith.constant 0 : index
    %17 = vector.load %arg1[%c88, %c0_7] : memref<472x128xf32, #tpu.memory_space<vmem>>, vector<32x128xf32>
    %c120 = arith.constant 120 : index
    %c0_8 = arith.constant 0 : index
    %18 = vector.load %arg1[%c120, %c0_8] : memref<472x128xf32, #tpu.memory_space<vmem>>, vector<32x128xf32>
    %c152 = arith.constant 152 : index
    %c0_9 = arith.constant 0 : index
    %19 = vector.load %arg1[%c152, %c0_9] : memref<472x128xf32, #tpu.memory_space<vmem>>, vector<128x64xf32>
    %cst_10 = arith.constant 1.000000e+00 : f32
    %20 = vector.broadcast %cst_10 : f32 to vector<32x32xf32>
    %c280 = arith.constant 280 : index
    %c0_11 = arith.constant 0 : index
    %21 = vector.load %arg1[%c280, %c0_11] : memref<472x128xf32, #tpu.memory_space<vmem>>, vector<32x96xf32>
    %c280_12 = arith.constant 280 : index
    %c96 = arith.constant 96 : index
    %22 = vector.load %arg1[%c280_12, %c96] : memref<472x128xf32, #tpu.memory_space<vmem>>, vector<32x32xf32>
    %c312 = arith.constant 312 : index
    %c0_13 = arith.constant 0 : index
    %23 = vector.load %arg1[%c312, %c0_13] : memref<472x128xf32, #tpu.memory_space<vmem>>, vector<32x64xf32>
    %c312_14 = arith.constant 312 : index
    %c96_15 = arith.constant 96 : index
    %24 = vector.load %arg1[%c312_14, %c96_15] : memref<472x128xf32, #tpu.memory_space<vmem>>, vector<64x32xf32>
    %c344 = arith.constant 344 : index
    %c0_16 = arith.constant 0 : index
    %25 = vector.load %arg1[%c344, %c0_16] : memref<472x128xf32, #tpu.memory_space<vmem>>, vector<1x96xf32>
    %c345 = arith.constant 345 : index
    %c0_17 = arith.constant 0 : index
    %26 = vector.load %arg1[%c345, %c0_17] : memref<472x128xf32, #tpu.memory_space<vmem>>, vector<1x32xf32>
    %c345_18 = arith.constant 345 : index
    %c32 = arith.constant 32 : index
    %27 = vector.load %arg1[%c345_18, %c32] : memref<472x128xf32, #tpu.memory_space<vmem>>, vector<1x32xf32>
    %c345_19 = arith.constant 345 : index
    %c64 = arith.constant 64 : index
    %28 = vector.load %arg1[%c345_19, %c64] : memref<472x128xf32, #tpu.memory_space<vmem>>, vector<1x32xf32>
    %c346 = arith.constant 346 : index
    %c0_20 = arith.constant 0 : index
    %29 = vector.load %arg1[%c346, %c0_20] : memref<472x128xf32, #tpu.memory_space<vmem>>, vector<1x64xf32>
    %c347 = arith.constant 347 : index
    %c0_21 = arith.constant 0 : index
    %30 = vector.load %arg1[%c347, %c0_21] : memref<472x128xf32, #tpu.memory_space<vmem>>, vector<1x32xf32>
    %c347_22 = arith.constant 347 : index
    %c32_23 = arith.constant 32 : index
    %31 = vector.load %arg1[%c347_22, %c32_23] : memref<472x128xf32, #tpu.memory_space<vmem>>, vector<1x32xf32>
    %c347_24 = arith.constant 347 : index
    %c64_25 = arith.constant 64 : index
    %32 = vector.load %arg1[%c347_24, %c64_25] : memref<472x128xf32, #tpu.memory_space<vmem>>, vector<1x32xf32>
    %cst_26 = arith.constant dense<0.000000e+00> : vector<32x96xf32>
    %33 = tpu.matmul %16, %21, %cst_26 {dimension_numbers = #tpu.dot_dimension_numbers<[1], [0], [0], [1], [0, 0, 1, 1], [], []>} : vector<32x32xf32>, vector<32x96xf32>, vector<32x96xf32> -> vector<32x96xf32>
    %34 = vector.broadcast %25 : vector<1x96xf32> to vector<32x96xf32>
    %35 = arith.addf %33, %34 : vector<32x96xf32>
    %36 = vector.extract_strided_slice %35 {offsets = [0, 0], sizes = [32, 32], strides = [1, 1]} : vector<32x96xf32> to vector<32x32xf32>
    %37 = vector.extract_strided_slice %35 {offsets = [0, 32], sizes = [32, 32], strides = [1, 1]} : vector<32x96xf32> to vector<32x32xf32>
    %38 = vector.extract_strided_slice %35 {offsets = [0, 64], sizes = [32, 32], strides = [1, 1]} : vector<32x96xf32> to vector<32x32xf32>
    %39 = tpu.transpose %37, [1, 0] : vector<32x32xf32> -> vector<32x32xf32>
    %40 = tpu.concatenate %39, %39, %39, %39 in 1 : vector<32x32xf32>, vector<32x32xf32>, vector<32x32xf32>, vector<32x32xf32> -> vector<32x128xf32>
    %41 = arith.mulf %40, %18 : vector<32x128xf32>
    %cst_27 = arith.constant dense<0.000000e+00> : vector<32x128xf32>
    %42 = tpu.matmul %36, %41, %cst_27 {dimension_numbers = #tpu.dot_dimension_numbers<[1], [0], [0], [1], [0, 0, 1, 1], [], []>} : vector<32x32xf32>, vector<32x128xf32>, vector<32x128xf32> -> vector<32x128xf32>
    %43 = arith.addf %42, %17 : vector<32x128xf32>
    %cst_28 = arith.constant dense<0xFF800000> : vector<32xf32>
    %44 = vector.multi_reduction <maximumf>, %43, %cst_28 [1] : vector<32x128xf32> to vector<32xf32>
    %45 = vector.shape_cast %44 : vector<32xf32> to vector<32x1xf32>
    %46 = vector.broadcast %45 : vector<32x1xf32> to vector<32x128xf32>
    %47 = arith.subf %43, %46 : vector<32x128xf32>
    %48 = math.exp %47 : vector<32x128xf32>
    %49 = tpu.concatenate %38, %20 in 1 : vector<32x32xf32>, vector<32x32xf32> -> vector<32x64xf32>
    %50 = tpu.concatenate %49, %49, %49, %49 in 0 : vector<32x64xf32>, vector<32x64xf32>, vector<32x64xf32>, vector<32x64xf32> -> vector<128x64xf32>
    %51 = arith.mulf %50, %19 : vector<128x64xf32>
    %cst_29 = arith.constant dense<0.000000e+00> : vector<32x64xf32>
    %52 = tpu.matmul %48, %51, %cst_29 {dimension_numbers = #tpu.dot_dimension_numbers<[1], [0], [0], [1], [0, 0, 1, 1], [], []>} : vector<32x128xf32>, vector<128x64xf32>, vector<32x64xf32> -> vector<32x64xf32>
    %53 = vector.extract_strided_slice %52 {offsets = [0, 0], sizes = [32, 32], strides = [1, 1]} : vector<32x64xf32> to vector<32x32xf32>
    %54 = vector.extract_strided_slice %52 {offsets = [0, 32], sizes = [32, 32], strides = [1, 1]} : vector<32x64xf32> to vector<32x32xf32>
    %cst_30 = arith.constant 9.99999968E-21 : f32
    %55 = vector.broadcast %cst_30 : f32 to vector<32x32xf32>
    %56 = arith.maximumf %54, %55 : vector<32x32xf32>
    %57 = tpu.reciprocal %56 {approx = true} : vector<32x32xf32> -> vector<32x32xf32>
    %58 = arith.mulf %53, %57 : vector<32x32xf32>
    %cst_31 = arith.constant dense<0.000000e+00> : vector<32x32xf32>
    %59 = tpu.matmul %58, %22, %cst_31 {dimension_numbers = #tpu.dot_dimension_numbers<[1], [0], [0], [1], [0, 0, 1, 1], [], []>} : vector<32x32xf32>, vector<32x32xf32>, vector<32x32xf32> -> vector<32x32xf32>
    %60 = vector.broadcast %26 : vector<1x32xf32> to vector<32x32xf32>
    %61 = arith.addf %59, %60 : vector<32x32xf32>
    %62 = arith.addf %16, %61 : vector<32x32xf32>
    %cst_32 = arith.constant dense<0.000000e+00> : vector<32xf32>
    %63 = vector.multi_reduction <add>, %62, %cst_32 [1] : vector<32x32xf32> to vector<32xf32>
    %64 = vector.shape_cast %63 : vector<32xf32> to vector<32x1xf32>
    %cst_33 = arith.constant 3.200000e+01 : f32
    %65 = vector.broadcast %cst_33 : f32 to vector<32x1xf32>
    %66 = arith.divf %64, %65 : vector<32x1xf32>
    %67 = vector.broadcast %66 : vector<32x1xf32> to vector<32x32xf32>
    %68 = arith.subf %62, %67 : vector<32x32xf32>
    %69 = arith.mulf %68, %68 : vector<32x32xf32>
    %cst_34 = arith.constant dense<0.000000e+00> : vector<32xf32>
    %70 = vector.multi_reduction <add>, %69, %cst_34 [1] : vector<32x32xf32> to vector<32xf32>
    %71 = vector.shape_cast %70 : vector<32xf32> to vector<32x1xf32>
    %cst_35 = arith.constant 3.200000e+01 : f32
    %72 = vector.broadcast %cst_35 : f32 to vector<32x1xf32>
    %73 = arith.divf %71, %72 : vector<32x1xf32>
    %74 = vector.broadcast %66 : vector<32x1xf32> to vector<32x32xf32>
    %75 = arith.subf %62, %74 : vector<32x32xf32>
    %cst_36 = arith.constant 9.99999974E-6 : f32
    %76 = vector.broadcast %cst_36 : f32 to vector<32x1xf32>
    %77 = arith.addf %73, %76 : vector<32x1xf32>
    %78 = math.rsqrt %77 : vector<32x1xf32>
    %79 = vector.broadcast %78 : vector<32x1xf32> to vector<32x32xf32>
    %80 = arith.mulf %75, %79 : vector<32x32xf32>
    %81 = vector.broadcast %27 : vector<1x32xf32> to vector<32x32xf32>
    %82 = arith.mulf %80, %81 : vector<32x32xf32>
    %83 = vector.broadcast %28 : vector<1x32xf32> to vector<32x32xf32>
    %84 = arith.addf %82, %83 : vector<32x32xf32>
    %cst_37 = arith.constant dense<0.000000e+00> : vector<32x64xf32>
    %85 = tpu.matmul %84, %23, %cst_37 {dimension_numbers = #tpu.dot_dimension_numbers<[1], [0], [0], [1], [0, 0, 1, 1], [], []>} : vector<32x32xf32>, vector<32x64xf32>, vector<32x64xf32> -> vector<32x64xf32>
    %86 = vector.broadcast %29 : vector<1x64xf32> to vector<32x64xf32>
    %87 = arith.addf %85, %86 : vector<32x64xf32>
    %cst_38 = arith.constant 5.000000e-01 : f32
    %88 = vector.broadcast %cst_38 : f32 to vector<32x64xf32>
    %89 = arith.mulf %88, %87 : vector<32x64xf32>
    %cst_39 = arith.constant 0.707106769 : f32
    %90 = vector.broadcast %cst_39 : f32 to vector<32x64xf32>
    %91 = arith.mulf %87, %90 : vector<32x64xf32>
    %92 = math.erf %91 : vector<32x64xf32>
    %cst_40 = arith.constant 1.000000e+00 : f32
    %93 = vector.broadcast %cst_40 : f32 to vector<32x64xf32>
    %94 = arith.addf %93, %92 : vector<32x64xf32>
    %95 = arith.mulf %89, %94 : vector<32x64xf32>
    %cst_41 = arith.constant dense<0.000000e+00> : vector<32x32xf32>
    %96 = tpu.matmul %95, %24, %cst_41 {dimension_numbers = #tpu.dot_dimension_numbers<[1], [0], [0], [1], [0, 0, 1, 1], [], []>} : vector<32x64xf32>, vector<64x32xf32>, vector<32x32xf32> -> vector<32x32xf32>
    %97 = vector.broadcast %30 : vector<1x32xf32> to vector<32x32xf32>
    %98 = arith.addf %96, %97 : vector<32x32xf32>
    %99 = arith.addf %84, %98 : vector<32x32xf32>
    %cst_42 = arith.constant dense<0.000000e+00> : vector<32xf32>
    %100 = vector.multi_reduction <add>, %99, %cst_42 [1] : vector<32x32xf32> to vector<32xf32>
    %101 = vector.shape_cast %100 : vector<32xf32> to vector<32x1xf32>
    %cst_43 = arith.constant 3.200000e+01 : f32
    %102 = vector.broadcast %cst_43 : f32 to vector<32x1xf32>
    %103 = arith.divf %101, %102 : vector<32x1xf32>
    %104 = vector.broadcast %103 : vector<32x1xf32> to vector<32x32xf32>
    %105 = arith.subf %99, %104 : vector<32x32xf32>
    %106 = arith.mulf %105, %105 : vector<32x32xf32>
    %cst_44 = arith.constant dense<0.000000e+00> : vector<32xf32>
    %107 = vector.multi_reduction <add>, %106, %cst_44 [1] : vector<32x32xf32> to vector<32xf32>
    %108 = vector.shape_cast %107 : vector<32xf32> to vector<32x1xf32>
    %cst_45 = arith.constant 3.200000e+01 : f32
    %109 = vector.broadcast %cst_45 : f32 to vector<32x1xf32>
    %110 = arith.divf %108, %109 : vector<32x1xf32>
    %111 = vector.broadcast %103 : vector<32x1xf32> to vector<32x32xf32>
    %112 = arith.subf %99, %111 : vector<32x32xf32>
    %cst_46 = arith.constant 9.99999974E-6 : f32
    %113 = vector.broadcast %cst_46 : f32 to vector<32x1xf32>
    %114 = arith.addf %110, %113 : vector<32x1xf32>
    %115 = math.rsqrt %114 : vector<32x1xf32>
    %116 = vector.broadcast %115 : vector<32x1xf32> to vector<32x32xf32>
    %117 = arith.mulf %112, %116 : vector<32x32xf32>
    %118 = vector.broadcast %31 : vector<1x32xf32> to vector<32x32xf32>
    %119 = arith.mulf %117, %118 : vector<32x32xf32>
    %120 = vector.broadcast %32 : vector<1x32xf32> to vector<32x32xf32>
    %121 = arith.addf %119, %120 : vector<32x32xf32>
    %c376 = arith.constant 376 : index
    %c0_47 = arith.constant 0 : index
    %122 = vector.load %arg1[%c376, %c0_47] : memref<472x128xf32, #tpu.memory_space<vmem>>, vector<32x96xf32>
    %c376_48 = arith.constant 376 : index
    %c96_49 = arith.constant 96 : index
    %123 = vector.load %arg1[%c376_48, %c96_49] : memref<472x128xf32, #tpu.memory_space<vmem>>, vector<32x32xf32>
    %c408 = arith.constant 408 : index
    %c0_50 = arith.constant 0 : index
    %124 = vector.load %arg1[%c408, %c0_50] : memref<472x128xf32, #tpu.memory_space<vmem>>, vector<32x64xf32>
    %c408_51 = arith.constant 408 : index
    %c96_52 = arith.constant 96 : index
    %125 = vector.load %arg1[%c408_51, %c96_52] : memref<472x128xf32, #tpu.memory_space<vmem>>, vector<64x32xf32>
    %c440 = arith.constant 440 : index
    %c0_53 = arith.constant 0 : index
    %126 = vector.load %arg1[%c440, %c0_53] : memref<472x128xf32, #tpu.memory_space<vmem>>, vector<1x96xf32>
    %c441 = arith.constant 441 : index
    %c0_54 = arith.constant 0 : index
    %127 = vector.load %arg1[%c441, %c0_54] : memref<472x128xf32, #tpu.memory_space<vmem>>, vector<1x32xf32>
    %c441_55 = arith.constant 441 : index
    %c32_56 = arith.constant 32 : index
    %128 = vector.load %arg1[%c441_55, %c32_56] : memref<472x128xf32, #tpu.memory_space<vmem>>, vector<1x32xf32>
    %c441_57 = arith.constant 441 : index
    %c64_58 = arith.constant 64 : index
    %129 = vector.load %arg1[%c441_57, %c64_58] : memref<472x128xf32, #tpu.memory_space<vmem>>, vector<1x32xf32>
    %c442 = arith.constant 442 : index
    %c0_59 = arith.constant 0 : index
    %130 = vector.load %arg1[%c442, %c0_59] : memref<472x128xf32, #tpu.memory_space<vmem>>, vector<1x64xf32>
    %c443 = arith.constant 443 : index
    %c0_60 = arith.constant 0 : index
    %131 = vector.load %arg1[%c443, %c0_60] : memref<472x128xf32, #tpu.memory_space<vmem>>, vector<1x32xf32>
    %c443_61 = arith.constant 443 : index
    %c32_62 = arith.constant 32 : index
    %132 = vector.load %arg1[%c443_61, %c32_62] : memref<472x128xf32, #tpu.memory_space<vmem>>, vector<1x32xf32>
    %c443_63 = arith.constant 443 : index
    %c64_64 = arith.constant 64 : index
    %133 = vector.load %arg1[%c443_63, %c64_64] : memref<472x128xf32, #tpu.memory_space<vmem>>, vector<1x32xf32>
    %cst_65 = arith.constant dense<0.000000e+00> : vector<32x96xf32>
    %134 = tpu.matmul %121, %122, %cst_65 {dimension_numbers = #tpu.dot_dimension_numbers<[1], [0], [0], [1], [0, 0, 1, 1], [], []>} : vector<32x32xf32>, vector<32x96xf32>, vector<32x96xf32> -> vector<32x96xf32>
    %135 = vector.broadcast %126 : vector<1x96xf32> to vector<32x96xf32>
    %136 = arith.addf %134, %135 : vector<32x96xf32>
    %137 = vector.extract_strided_slice %136 {offsets = [0, 0], sizes = [32, 32], strides = [1, 1]} : vector<32x96xf32> to vector<32x32xf32>
    %138 = vector.extract_strided_slice %136 {offsets = [0, 32], sizes = [32, 32], strides = [1, 1]} : vector<32x96xf32> to vector<32x32xf32>
    %139 = vector.extract_strided_slice %136 {offsets = [0, 64], sizes = [32, 32], strides = [1, 1]} : vector<32x96xf32> to vector<32x32xf32>
    %140 = tpu.transpose %138, [1, 0] : vector<32x32xf32> -> vector<32x32xf32>
    %141 = tpu.concatenate %140, %140, %140, %140 in 1 : vector<32x32xf32>, vector<32x32xf32>, vector<32x32xf32>, vector<32x32xf32> -> vector<32x128xf32>
    %142 = arith.mulf %141, %18 : vector<32x128xf32>
    %cst_66 = arith.constant dense<0.000000e+00> : vector<32x128xf32>
    %143 = tpu.matmul %137, %142, %cst_66 {dimension_numbers = #tpu.dot_dimension_numbers<[1], [0], [0], [1], [0, 0, 1, 1], [], []>} : vector<32x32xf32>, vector<32x128xf32>, vector<32x128xf32> -> vector<32x128xf32>
    %144 = arith.addf %143, %17 : vector<32x128xf32>
    %cst_67 = arith.constant dense<0xFF800000> : vector<32xf32>
    %145 = vector.multi_reduction <maximumf>, %144, %cst_67 [1] : vector<32x128xf32> to vector<32xf32>
    %146 = vector.shape_cast %145 : vector<32xf32> to vector<32x1xf32>
    %147 = vector.broadcast %146 : vector<32x1xf32> to vector<32x128xf32>
    %148 = arith.subf %144, %147 : vector<32x128xf32>
    %149 = math.exp %148 : vector<32x128xf32>
    %150 = tpu.concatenate %139, %20 in 1 : vector<32x32xf32>, vector<32x32xf32> -> vector<32x64xf32>
    %151 = tpu.concatenate %150, %150, %150, %150 in 0 : vector<32x64xf32>, vector<32x64xf32>, vector<32x64xf32>, vector<32x64xf32> -> vector<128x64xf32>
    %152 = arith.mulf %151, %19 : vector<128x64xf32>
    %cst_68 = arith.constant dense<0.000000e+00> : vector<32x64xf32>
    %153 = tpu.matmul %149, %152, %cst_68 {dimension_numbers = #tpu.dot_dimension_numbers<[1], [0], [0], [1], [0, 0, 1, 1], [], []>} : vector<32x128xf32>, vector<128x64xf32>, vector<32x64xf32> -> vector<32x64xf32>
    %154 = vector.extract_strided_slice %153 {offsets = [0, 0], sizes = [32, 32], strides = [1, 1]} : vector<32x64xf32> to vector<32x32xf32>
    %155 = vector.extract_strided_slice %153 {offsets = [0, 32], sizes = [32, 32], strides = [1, 1]} : vector<32x64xf32> to vector<32x32xf32>
    %cst_69 = arith.constant 9.99999968E-21 : f32
    %156 = vector.broadcast %cst_69 : f32 to vector<32x32xf32>
    %157 = arith.maximumf %155, %156 : vector<32x32xf32>
    %158 = tpu.reciprocal %157 {approx = true} : vector<32x32xf32> -> vector<32x32xf32>
    %159 = arith.mulf %154, %158 : vector<32x32xf32>
    %cst_70 = arith.constant dense<0.000000e+00> : vector<32x32xf32>
    %160 = tpu.matmul %159, %123, %cst_70 {dimension_numbers = #tpu.dot_dimension_numbers<[1], [0], [0], [1], [0, 0, 1, 1], [], []>} : vector<32x32xf32>, vector<32x32xf32>, vector<32x32xf32> -> vector<32x32xf32>
    %161 = vector.broadcast %127 : vector<1x32xf32> to vector<32x32xf32>
    %162 = arith.addf %160, %161 : vector<32x32xf32>
    %163 = arith.addf %121, %162 : vector<32x32xf32>
    %cst_71 = arith.constant dense<0.000000e+00> : vector<32xf32>
    %164 = vector.multi_reduction <add>, %163, %cst_71 [1] : vector<32x32xf32> to vector<32xf32>
    %165 = vector.shape_cast %164 : vector<32xf32> to vector<32x1xf32>
    %cst_72 = arith.constant 3.200000e+01 : f32
    %166 = vector.broadcast %cst_72 : f32 to vector<32x1xf32>
    %167 = arith.divf %165, %166 : vector<32x1xf32>
    %168 = vector.broadcast %167 : vector<32x1xf32> to vector<32x32xf32>
    %169 = arith.subf %163, %168 : vector<32x32xf32>
    %170 = arith.mulf %169, %169 : vector<32x32xf32>
    %cst_73 = arith.constant dense<0.000000e+00> : vector<32xf32>
    %171 = vector.multi_reduction <add>, %170, %cst_73 [1] : vector<32x32xf32> to vector<32xf32>
    %172 = vector.shape_cast %171 : vector<32xf32> to vector<32x1xf32>
    %cst_74 = arith.constant 3.200000e+01 : f32
    %173 = vector.broadcast %cst_74 : f32 to vector<32x1xf32>
    %174 = arith.divf %172, %173 : vector<32x1xf32>
    %175 = vector.broadcast %167 : vector<32x1xf32> to vector<32x32xf32>
    %176 = arith.subf %163, %175 : vector<32x32xf32>
    %cst_75 = arith.constant 9.99999974E-6 : f32
    %177 = vector.broadcast %cst_75 : f32 to vector<32x1xf32>
    %178 = arith.addf %174, %177 : vector<32x1xf32>
    %179 = math.rsqrt %178 : vector<32x1xf32>
    %180 = vector.broadcast %179 : vector<32x1xf32> to vector<32x32xf32>
    %181 = arith.mulf %176, %180 : vector<32x32xf32>
    %182 = vector.broadcast %128 : vector<1x32xf32> to vector<32x32xf32>
    %183 = arith.mulf %181, %182 : vector<32x32xf32>
    %184 = vector.broadcast %129 : vector<1x32xf32> to vector<32x32xf32>
    %185 = arith.addf %183, %184 : vector<32x32xf32>
    %cst_76 = arith.constant dense<0.000000e+00> : vector<32x64xf32>
    %186 = tpu.matmul %185, %124, %cst_76 {dimension_numbers = #tpu.dot_dimension_numbers<[1], [0], [0], [1], [0, 0, 1, 1], [], []>} : vector<32x32xf32>, vector<32x64xf32>, vector<32x64xf32> -> vector<32x64xf32>
    %187 = vector.broadcast %130 : vector<1x64xf32> to vector<32x64xf32>
    %188 = arith.addf %186, %187 : vector<32x64xf32>
    %cst_77 = arith.constant 5.000000e-01 : f32
    %189 = vector.broadcast %cst_77 : f32 to vector<32x64xf32>
    %190 = arith.mulf %189, %188 : vector<32x64xf32>
    %cst_78 = arith.constant 0.707106769 : f32
    %191 = vector.broadcast %cst_78 : f32 to vector<32x64xf32>
    %192 = arith.mulf %188, %191 : vector<32x64xf32>
    %193 = math.erf %192 : vector<32x64xf32>
    %cst_79 = arith.constant 1.000000e+00 : f32
    %194 = vector.broadcast %cst_79 : f32 to vector<32x64xf32>
    %195 = arith.addf %194, %193 : vector<32x64xf32>
    %196 = arith.mulf %190, %195 : vector<32x64xf32>
    %cst_80 = arith.constant dense<0.000000e+00> : vector<32x32xf32>
    %197 = tpu.matmul %196, %125, %cst_80 {dimension_numbers = #tpu.dot_dimension_numbers<[1], [0], [0], [1], [0, 0, 1, 1], [], []>} : vector<32x64xf32>, vector<64x32xf32>, vector<32x32xf32> -> vector<32x32xf32>
    %198 = vector.broadcast %131 : vector<1x32xf32> to vector<32x32xf32>
    %199 = arith.addf %197, %198 : vector<32x32xf32>
    %200 = arith.addf %185, %199 : vector<32x32xf32>
    %cst_81 = arith.constant dense<0.000000e+00> : vector<32xf32>
    %201 = vector.multi_reduction <add>, %200, %cst_81 [1] : vector<32x32xf32> to vector<32xf32>
    %202 = vector.shape_cast %201 : vector<32xf32> to vector<32x1xf32>
    %cst_82 = arith.constant 3.200000e+01 : f32
    %203 = vector.broadcast %cst_82 : f32 to vector<32x1xf32>
    %204 = arith.divf %202, %203 : vector<32x1xf32>
    %205 = vector.broadcast %204 : vector<32x1xf32> to vector<32x32xf32>
    %206 = arith.subf %200, %205 : vector<32x32xf32>
    %207 = arith.mulf %206, %206 : vector<32x32xf32>
    %cst_83 = arith.constant dense<0.000000e+00> : vector<32xf32>
    %208 = vector.multi_reduction <add>, %207, %cst_83 [1] : vector<32x32xf32> to vector<32xf32>
    %209 = vector.shape_cast %208 : vector<32xf32> to vector<32x1xf32>
    %cst_84 = arith.constant 3.200000e+01 : f32
    %210 = vector.broadcast %cst_84 : f32 to vector<32x1xf32>
    %211 = arith.divf %209, %210 : vector<32x1xf32>
    %212 = vector.broadcast %204 : vector<32x1xf32> to vector<32x32xf32>
    %213 = arith.subf %200, %212 : vector<32x32xf32>
    %cst_85 = arith.constant 9.99999974E-6 : f32
    %214 = vector.broadcast %cst_85 : f32 to vector<32x1xf32>
    %215 = arith.addf %211, %214 : vector<32x1xf32>
    %216 = math.rsqrt %215 : vector<32x1xf32>
    %217 = vector.broadcast %216 : vector<32x1xf32> to vector<32x32xf32>
    %218 = arith.mulf %213, %217 : vector<32x32xf32>
    %219 = vector.broadcast %132 : vector<1x32xf32> to vector<32x32xf32>
    %220 = arith.mulf %218, %219 : vector<32x32xf32>
    %221 = vector.broadcast %133 : vector<1x32xf32> to vector<32x32xf32>
    %222 = arith.addf %220, %221 : vector<32x32xf32>
    %c48 = arith.constant 48 : index
    %c0_86 = arith.constant 0 : index
    %223 = vector.load %arg1[%c48, %c0_86] : memref<472x128xf32, #tpu.memory_space<vmem>>, vector<32x64xf32>
    %c80 = arith.constant 80 : index
    %c0_87 = arith.constant 0 : index
    %224 = vector.load %arg1[%c80, %c0_87] : memref<472x128xf32, #tpu.memory_space<vmem>>, vector<1x64xf32>
    %cst_88 = arith.constant dense<0.000000e+00> : vector<32x64xf32>
    %225 = tpu.matmul %222, %223, %cst_88 {dimension_numbers = #tpu.dot_dimension_numbers<[1], [0], [0], [1], [0, 0, 1, 1], [], []>} : vector<32x32xf32>, vector<32x64xf32>, vector<32x64xf32> -> vector<32x64xf32>
    %226 = vector.broadcast %224 : vector<1x64xf32> to vector<32x64xf32>
    %227 = arith.addf %225, %226 : vector<32x64xf32>
    %228 = vector.extract_strided_slice %227 {offsets = [0, 0], sizes = [16, 64], strides = [1, 1]} : vector<32x64xf32> to vector<16x64xf32>
    %229 = vector.extract_strided_slice %227 {offsets = [16, 0], sizes = [16, 64], strides = [1, 1]} : vector<32x64xf32> to vector<16x64xf32>
    %230 = tpu.concatenate %228, %229 in 1 : vector<16x64xf32>, vector<16x64xf32> -> vector<16x128xf32>
    %c0_89 = arith.constant 0 : index
    %c0_90 = arith.constant 0 : index
    %231 = vector.load %arg2[%c0_89, %c0_90] : memref<16x128xf32, #tpu.memory_space<vmem>>, vector<16x128xf32>
    tpu.vector_store %arg2[%c0_89, %c0_90], %230 {strides = array<i32>} : memref<16x128xf32, #tpu.memory_space<vmem>>, vector<16x128xf32>,
    return
  }
}

</mosaic_0001>

<bundles_post_ra>
// kernel: tpu_custom_call.1
= control target key start
LH: loop header
LB: loop body
LE: loop exit
PB: predicated region body
PF: predicated region fallthrough
CT: control target
= control target key end

     0   :  { %7 = vsyncpa [#allocation3], 0  ;;  %s3654_s0 = inlined_call_operand.hbm [shape: f32[1,64], index: 0, kind: input, shape index: {}]   ;;  %s3655_s1 = inlined_call_operand.hbm [shape: f32[472,128], index: 1, kind: input, shape index: {}]   ;;  %s3656_s2 = inlined_call_operand.hbm [shape: f32[16,128], index: 2, kind: output, shape index: {}]  }
   0x1   :  { %8 = vsyncpa [#allocation6], 0 }
   0x2   :  { %9 = vsyncpa [#allocation4], 0  ;;  %s3151_s9 = smov [#allocation2]   ;;  %s3152_s11 = smov [#allocation5]  }
   0x3   :  { %s16_s10 = sshll.u32 %s3151_s9, 4  ;;  %s25_s12 = sshll.u32 %s3152_s11, 4  ;;  %s17_s10 = int_to_ptr.vmem [resolvable:$true] %s16_s10  ;;  %s3176_s12 = int_to_ptr.vmem [resolvable:$true] %s25_s12 }
   0x4   :  { %s3079_s15 = scalar_lea.hbm %s3654_s0, 16 }
   0x5   :  { %p3080_p0 = scmp.ne.s32.totalorder %s3654_s0, %s3079_s15  ;;  %p3083_p1 = scmp.lt.u32.totalorder %s3079_s15, %s3654_s0 }
   0x7   :  { %p3085_p2 = pnand %p3083_p1, %p3080_p0 }
   0x9   :  { %3088 = shalt.err (!%p3085_p2)
}
   0xa   :  { %s3089_s20 = scalar_lea.vmem %s17_s10, 16  ;;  %s3093_s21 = scalar_lea.vmem %s17_s10, 32 }
   0xb   :  { %p3090_p3 = scmp.ne.s32.totalorder %s17_s10, %s3089_s20  ;;  %p3094_p4 = scmp.lt.s32.totalorder %s17_s10, %s17_s10 }
   0xc   :  { %p3095_p5 = scmp.lt.s32.totalorder %s3093_s21, %s3089_s20 }
   0xe   :  { %p3096_p6 = por %p3095_p5, %p3094_p4 }
  0x10   :  { %p3097_p7 = pnand %p3096_p6, %p3090_p3 }
  0x12   :  { %3100 = shalt.err (!%p3097_p7)
}
  0x13   :  { %19 = dma.hbm_to_vmem [thread:$0]  %s3654_s0, 16, %s17_s10, [#allocation3]  }
  0x14   :  { %s3101_s26 = scalar_lea.hbm %s3655_s1, 7552 }
  0x15   :  { %p3102_p8 = scmp.ne.s32.totalorder %s3655_s1, %s3101_s26  ;;  %p3105_p9 = scmp.lt.u32.totalorder %s3101_s26, %s3655_s1 }
  0x17   :  { %p3107_p10 = pnand %p3105_p9, %p3102_p8 }
  0x19   :  { %3110 = shalt.err (!%p3107_p10)
}
  0x1a   :  { %s3111_s3 = scalar_lea.vmem %s3176_s12, 7552  ;;  %p3116_p12 = scmp.lt.s32.totalorder %s3176_s12, %s3176_s12 }
  0x1b   :  { %p3112_p11 = scmp.ne.s32.totalorder %s3176_s12, %s3111_s3  ;;  %p3117_p13 = scmp.lt.s32.totalorder %s3111_s3, %s3111_s3 }
  0x1d   :  { %p3118_p0 = por %p3117_p13, %p3116_p12 }
  0x1f   :  { %p3119_p1 = pnand %p3118_p0, %p3112_p11 }
  0x21   :  { %3122 = shalt.err (!%p3119_p1)
}
  0x22   :  { %s3153_s0 = smov 128   ;;  %s3154_s4 = smov 8  }
  0x23   :  { %31 = dma.hbm_to_vmem [thread:$0]  %s3655_s1, 7552, %s3176_s12, [#allocation6], %s3153_s0, %s3153_s0, %s3154_s4  }
  0x24   :  { %3145 = dma.done.wait [#allocation3], 16  }
  0x25   :  { %3146 = vsyncadd [#allocation3], 4294967280 }
  0x26   :  { %3147 = dma.done.wait [#allocation6], 7552  }
  0x27   :  { %3148 = vsyncadd [#allocation6], 4294959744  ;;  %v3155_v0 = vmov 8   ;;  %v39_v1 = vld [vmem:[#allocation5] sm:$0xff]  ;;  %v3156_v2 = vmov 9   ;;  %vm59_vm0 = vcmask 64512  }
  0x28   :  { %2937 = vset.pattern.permute.xlu0 %v3155_v0  ;;  %2505 = vmatprep.mubr.msk.f32.mxu0 %vm59_vm0, %v39_v1  ;;  %v3211_v3 = vld [vmem:[#allocation5 + $0x118] sm:$0xff]  ;;  %v3213_v4 = vld [vmem:[#allocation5 + $0x120] sm:$0xff]  ;;  %v40_v13 = vld [vmem:[#allocation5 + $0x8] sm:$0xff]  ;;  %vm200_vm1 = vcmask 261120   ;;  %s3157_s1 = smov 96   ;;  %s3158_s7 = smov 64  }
  0x29   :  { %43 = vperm.xlu0 %2937, %v39_v1   ;;  %v2939_v5 = vpack.i.bf16 %v3213_v4, %v3211_v3  ;;  %v2754_v6 = vpack.c.bf16 %v3213_v4, %v3211_v3  ;;  %v2308_v8 = vld [vmem:[#allocation2] ss:$0 sm:$0xff]  ;;  %v3220_v14 = vld [vmem:[#allocation5 + $0x128] sm:$0xff]  ;;  %v3222_v15 = vld [vmem:[#allocation5 + $0x130] sm:$0xff]  ;;  %s3159_s8 = smov 32   ;;  %vm390_vm2 = vcmask 523264  }
  0x2a   :  { %v2758_v16 = vpack.c.bf16 %v3222_v15, %v3220_v14  ;;  %v148_v17 = vld [vmem:[#allocation5 + $0x10] sm:$0xff]  ;;  %v149_v19 = vld [vmem:[#allocation5 + $0x18] sm:$0xff]  ;;  %v150_v23 = vld [vmem:[#allocation5 + $0x20] sm:$0xff]  ;;  %vm395_vm3 = vcmask 785408   ;;  %s3160_s9 = smov [#allocation7]  }
  0x2b   :  { %2755 = vmatprep.subr.bf16.mxu1 %v2754_v6  ;;  %v151_v26 = vld [vmem:[#allocation5 + $0x28] sm:$0xff]  ;;  %v2311_v29 = vld [vmem:[#allocation5 + $0x158] ss:$0 sm:$0xff]  ;;  %v3283_v56 = vld [vmem:[#allocation5 + $0x80] sm:$0xff]  ;;  %s2295_s10 = sshll.u32 %s3160_s9, 4  ;;  %s2296_s10 = int_to_ptr.vmem [resolvable:$true] %s2295_s10 }
  0x2c   :  { %2757 = vmatpush3.bf16.msra.mxu1 %v2754_v6  ;;  %v3279_v53 = vld [vmem:[#allocation5 + $0x78] sm:$0xff]  ;;  %s3123_s11 = scalar_lea.vmem %s2296_s10, 256  ;;  %p3128_p3 = scmp.lt.s32.totalorder %s2296_s10, %s2296_s10 }
  0x2d   :  { %2938 = vset.pattern.permute.xlu0 %v3156_v2  ;;  %2759 = vmatprep.subr.bf16.mxu1 %v2758_v16  ;;  %p3124_p2 = scmp.ne.s32.totalorder %s2296_s10, %s3123_s11  ;;  %p3129_p4 = scmp.lt.s32.totalorder %s3123_s11, %s3123_s11 }
  0x2e   :  { %54 = vperm.xlu0 %2938, %v39_v1  }
  0x2f   :  { %p3130_p5 = por %p3129_p4, %p3128_p3 }
  0x30   :  { %2761 = vmatpush3.bf16.msra.mxu1 %v2758_v16 }
  0x31   :  { %p3131_p6 = pnand %p3130_p5, %p3124_p2 }
  0xa8   :  { %v44_v7 = vpop.permute.xlu0 %43 }
  0xa9   :  { %v52_v9 = vmul.f32 %v2308_v8, %v44_v7 }
  0xad   :  { %v55_v10 = vpop.permute.xlu0 %54 }
  0xae   :  { %v57_v11 = vadd.f32 %v55_v10, %v52_v9  ;;  %v3291_v9 = vld [vmem:[#allocation5 + $0x88] sm:$0xff] }
  0xb0   :  { %v58_v12 = vmax.f32 %v57_v11, 0.0 }
  0xb2   :  { %2503 = vmatprep.subr.mxu0 %v58_v12 }
  0xb3   :  { %2504 = vmatpush3.msra.mxu0 %v58_v12  ;;  %v3295_v12 = vld [vmem:[#allocation5 + $0x90] sm:$0xff] }
  0xb4   :  { %2506 = vmatmul.mubr.msk.f32.vlgmr.msra.gmra.mrb[0].mxu0 %vm59_vm0, %v40_v13 }
 0x187   :  { %v2507_v18 = vpop.f32.mrb[0].mxu0 }
 0x188   :  { %v131_v20 = vpop.f32.mrb[1].mxu0  ;;  %v3229_v22 = vadd.f32 %v2507_v18, %v149_v19 }
 0x189   :  { %142 = vrot.lane.b32.xlu1 %v131_v20, %s3157_s1  ;;  %v3227_v21 = vadd.f32 %v148_v17, %v131_v20 }
 0x18b   :  { %2516 = vmatprep.mubr.msk.f32.mxu1 %vm200_vm1, %v3227_v21 }
 0x18c   :  { %2517 = vmatmul.mubr.msk.f32.vlgmr.msra.gmra.mrb[0].mxu1 %vm200_vm1, %v3229_v22 }
 0x18d   :  { %144 = vrot.lane.b32.xlu1 %v2507_v18, %s3157_s1 }
 0x1fb   :  { %v143_v24 = vpop.permute.xlu1 %142 }
 0x1fc   :  { %v3236_v25 = vadd.f32 %v150_v23, %v143_v24  ;;  %v3301_v23 = vld [vmem:[#allocation5 + $0xa0] sm:$0xff] }
 0x1fe   :  { %2519 = vmatprep.mubr.msk.f32.mxu1 %vm200_vm1, %v3236_v25 }
 0x1ff   :  { %v145_v27 = vpop.permute.xlu1 %144 }
 0x200   :  { %v3240_v28 = vadd.f32 %v151_v26, %v145_v27  ;;  %v3304_v26 = vld [vmem:[#allocation5 + $0x98] sm:$0xff] }
 0x202   :  { %2520 = vmatmul.mubr.msk.f32.gmra.mrb[2].mxu1 %vm200_vm1, %v3240_v28 }
 0x25f   :  { %v2518_v30 = vpop.f32.mrb[0].mxu1 }
 0x260   :  { %v3244_v31 = vadd.f32 %v2518_v30, %v2311_v29  ;;  %v279_v32 = vpop.f32.mrb[1].mxu1 }
 0x261   :  { %v280_v33 = vadd.f32 %v2311_v29, %v279_v32 }
 0x262   :  { %304 = vrot.lane.b32.xlu0 %v3244_v31, %s3157_s1 }
 0x263   :  { %302 = vrot.lane.b32.xlu1 %v280_v33, %s3157_s1  ;;  %2530 = vmatprep.mubr.msk.f32.mxu0 %vm200_vm1, %v280_v33 }
 0x2d4   :  { %v305_v39 = vpop.permute.xlu0 %304 }
 0x2d5   :  { %v2521_v34 = vpop.f32.mrb[2].mxu1  ;;  %v303_v38 = vpop.permute.xlu1 %302 }
 0x2d6   :  { %v3250_v35 = vadd.f32 %v2521_v34, %v2311_v29  ;;  %v289_v36 = vpop.f32.mrb[3].mxu1 }
 0x2d7   :  { %v3252_v37 = vadd.f32 %v2311_v29, %v289_v36 }
 0x2d8   :  { %308 = vrot.lane.b32.xlu0 %v3250_v35, %s3157_s1 }
 0x2d9   :  { %306 = vrot.lane.b32.xlu1 %v3252_v37, %s3157_s1 }
 0x302   :  { %314 = vxpose.xlu1.b32.start [1/4] (short) (narrow) %v303_v38, 32  ;;  %v3311_v38 = vld [vmem:[#allocation5 + $0xb8] sm:$0xff] }
 0x306   :  { %315 = vxpose.xlu1.b32.cont [2/4] (short) (narrow) %v305_v39, 32  ;;  %v3313_v39 = vld [vmem:[#allocation5 + $0xa8] sm:$0xff] }
 0x34a   :  { %v309_v41 = vpop.permute.xlu0 %308 }
 0x34b   :  { %v307_v40 = vpop.permute.xlu1 %306 }
 0x34c   :  { %316 = vxpose.xlu1.b32.cont [3/4] (short) (narrow) %v307_v40, 32 }
 0x350   :  { %317 = vxpose.xlu1.b32.end [4/4] (short) (narrow) %v309_v41, 32  ;;  %v3318_v41 = vld [vmem:[#allocation5 + $0xb0] sm:$0xff] }
 0x36e   :  { %519 = vrot.lane.b32.xlu1 %v3244_v31, %s3158_s7 }
 0x3c4   :  { %v330_v42 = vpop.trf.xlu1 }
 0x3c5   :  { %350 = vrot.lane.b32.xlu0 %v330_v42, %s3159_s8 }
 0x3c8   :  { %v331_v43 = vpop.trf.xlu1 }
 0x3c9   :  { %362 = vrot.lane.b32.xlu0 %v330_v42, %s3158_s7 }
 0x3cc   :  { %v332_v44 = vpop.trf.xlu1 }
 0x3cd   :  { %374 = vrot.lane.b32.xlu0 %v330_v42, %s3157_s1 }
 0x3d0   :  { %v333_v45 = vpop.trf.xlu1 }
 0x3d1   :  { %352 = vrot.lane.b32.xlu0 %v331_v43, %s3159_s8 }
 0x3d5   :  { %364 = vrot.lane.b32.xlu0 %v331_v43, %s3158_s7 }
 0x3d9   :  { %376 = vrot.lane.b32.xlu0 %v331_v43, %s3157_s1 }
 0x3dd   :  { %354 = vrot.lane.b32.xlu0 %v332_v44, %s3159_s8 }
 0x3e0   :  { %v520_v13 = vpop.permute.xlu1 %519 }
 0x3e1   :  { %366 = vrot.lane.b32.xlu0 %v332_v44, %s3158_s7  ;;  %v530_v24 = vsel %vm200_vm1, %v520_v13, 1.0 }
 0x3e2   :  { %v534_v32 = vmul.f32 %v530_v24, %v3301_v23 }
 0x3e5   :  { %378 = vrot.lane.b32.xlu0 %v332_v44, %s3157_s1 }
 0x3e9   :  { %356 = vrot.lane.b32.xlu0 %v333_v45, %s3159_s8 }
 0x3ed   :  { %368 = vrot.lane.b32.xlu0 %v333_v45, %s3158_s7 }
 0x3f1   :  { %380 = vrot.lane.b32.xlu0 %v333_v45, %s3157_s1 }
 0x3f5   :  { %517 = vrot.lane.b32.xlu0 %v280_v33, %s3158_s7 }
 0x3f9   :  { %521 = vrot.lane.b32.xlu0 %v3252_v37, %s3158_s7 }
 0x3fd   :  { %523 = vrot.lane.b32.xlu0 %v3250_v35, %s3158_s7 }
 0x437   :  { %v351_v46 = vpop.permute.xlu0 %350 }
 0x438   :  { %v386_v51 = vsel %vm200_vm1, %v330_v42, %v351_v46 }
 0x43b   :  { %v363_v47 = vpop.permute.xlu0 %362 }
 0x43c   :  { %v391_v52 = vsel %vm390_vm2, %v386_v51, %v363_v47  ;;  %v3328_v47 = vld [vmem:[#allocation5 + $0xd0] sm:$0xff] }
 0x43f   :  { %v375_v48 = vpop.permute.xlu0 %374 }
 0x440   :  { %v396_v54 = vsel %vm395_vm3, %v391_v52, %v375_v48  ;;  %v3334_v52 = vld [vmem:[#allocation5 + $0xd8] sm:$0xff] }
 0x441   :  { %v400_v60 = vmul.f32 %v396_v54, %v3279_v53 }
 0x443   :  { %v353_v49 = vpop.permute.xlu0 %352 }
 0x444   :  { %v387_v55 = vsel %vm200_vm1, %v331_v43, %v353_v49  ;;  %v3320_v43 = vld [vmem:[#allocation5 + $0xc0] sm:$0xff]  ;;  %v3331_v49 = vld [vmem:[#allocation5 + $0xc8] sm:$0xff] }
 0x447   :  { %v365_v50 = vpop.permute.xlu0 %364 }
 0x448   :  { %v392_v57 = vsel %vm390_vm2, %v387_v55, %v365_v50  ;;  %v3337_v55 = vld [vmem:[#allocation5 + $0xe0] sm:$0xff] }
 0x44b   :  { %v377_v58 = vpop.permute.xlu0 %376 }
 0x44c   :  { %v397_v59 = vsel %vm395_vm3, %v392_v57, %v377_v58  ;;  %v3340_v58 = vld [vmem:[#allocation5 + $0xf0] sm:$0xff] }
 0x44d   :  { %v401_v61 = vmul.f32 %v397_v59, %v3283_v56  ;;  %v542_v59 = vmul.f32 %v530_v24, %v3337_v55 }
 0x44f   :  { %v355_v62 = vpop.permute.xlu0 %354  ;;  %v2762_v63 = vpack.c.bf16 %v401_v61, %v400_v60  ;;  %v3343_v60 = vld [vmem:[#allocation5 + $0xe8] sm:$0xff] }
 0x450   :  { %v388_v7 = vsel %vm200_vm1, %v332_v44, %v355_v62 }
 0x451   :  { %2763 = vmatprep.subr.bf16.mxu0 %v2762_v63 }
 0x452   :  { %2765 = vmatpush3.bf16.msra.mxu0 %v2762_v63  ;;  %v3346_v63 = vld [vmem:[#allocation5 + $0xf8] sm:$0xff] }
 0x453   :  { %v367_v0 = vpop.permute.xlu0 %366 }
 0x454   :  { %v393_v8 = vsel %vm390_vm2, %v388_v7, %v367_v0  ;;  %v3352_v7 = vld [vmem:[#allocation5 + $0x110] sm:$0xff] }
 0x457   :  { %v379_v1 = vpop.permute.xlu0 %378 }
 0x458   :  { %v398_v10 = vsel %vm395_vm3, %v393_v8, %v379_v1  ;;  %v3349_v1 = vld [vmem:[#allocation5 + $0x100] sm:$0xff] }
 0x459   :  { %v402_v19 = vmul.f32 %v398_v10, %v3291_v9  ;;  %v546_v8 = vmul.f32 %v530_v24, %v3349_v1  ;;  %v3355_v10 = vld [vmem:[#allocation5 + $0x108] sm:$0xff] }
 0x45b   :  { %v357_v2 = vpop.permute.xlu0 %356 }
 0x45c   :  { %v389_v11 = vsel %vm200_vm1, %v333_v45, %v357_v2 }
 0x45f   :  { %v369_v6 = vpop.permute.xlu0 %368 }
 0x460   :  { %v394_v16 = vsel %vm390_vm2, %v389_v11, %v369_v6 }
 0x463   :  { %v381_v17 = vpop.permute.xlu0 %380 }
 0x464   :  { %v399_v18 = vsel %vm395_vm3, %v394_v16, %v381_v17 }
 0x465   :  { %v403_v20 = vmul.f32 %v399_v18, %v3295_v12  ;;  %v3359_v18 = vld [vmem:[#allocation5 + $0x60] sm:$0xff] }
 0x467   :  { %v518_v27 = vpop.permute.xlu0 %517  ;;  %v2766_v29 = vpack.c.bf16 %v403_v20, %v402_v19  ;;  %v3361_v19 = vld [vmem:[#allocation5 + $0x58] sm:$0xff] }
 0x468   :  { %v529_v30 = vsel %vm200_vm1, %v518_v27, 1.0 }
 0x469   :  { %v533_v33 = vmul.f32 %v529_v30, %v3304_v26  ;;  %2767 = vmatprep.subr.bf16.mxu0 %v2766_v29  ;;  %v545_v2 = vmul.f32 %v529_v30, %v3346_v63 }
 0x46a   :  { %2769 = vmatpush3.bf16.msra.mxu0 %v2766_v29 }
 0x46b   :  { %v522_v34 = vpop.permute.xlu0 %521  ;;  %v2770_v36 = vpack.c.bf16 %v534_v32, %v533_v33  ;;  %v2794_v13 = vpack.c.bf16 %v546_v8, %v545_v2 }
 0x46c   :  { %v531_v40 = vsel %vm200_vm1, %v522_v34, 1.0 }
 0x46d   :  { %2531 = vmatmul.mubr.msk.f32.vlgmr.msra.gmra.mrb[2].mxu0 %vm200_vm1, %v3244_v31  ;;  %2771 = vmatprep.subr.bf16.mxu1 %v2770_v36  ;;  %v537_v31 = vmul.f32 %v529_v30, %v3311_v38  ;;  %v535_v45 = vmul.f32 %v531_v40, %v3313_v39  ;;  %v539_v54 = vmul.f32 %v531_v40, %v3331_v49 }
 0x46e   :  { %2533 = vmatprep.mubr.msk.f32.mxu0 %vm200_vm1, %v3252_v37  ;;  %2773 = vmatpush3.bf16.msra.mxu1 %v2770_v36  ;;  %v538_v37 = vmul.f32 %v530_v24, %v3320_v43  ;;  %v543_v0 = vmul.f32 %v531_v40, %v3343_v60  ;;  %v547_v16 = vmul.f32 %v531_v40, %v3355_v10  ;;  %v3368_v36 = vld [vmem:[#allocation5 + $0x70] sm:$0xff] }
 0x46f   :  { %v524_v42 = vpop.permute.xlu0 %523 }
 0x470   :  { %v532_v44 = vsel %vm200_vm1, %v524_v42, 1.0  ;;  %v2778_v51 = vpack.c.bf16 %v538_v37, %v537_v31 }
 0x471   :  { %v536_v46 = vmul.f32 %v532_v44, %v3318_v41  ;;  %2534 = vmatmul.mubr.msk.f32.gmra.mrb[4].mxu0 %vm200_vm1, %v3250_v35  ;;  %v540_v50 = vmul.f32 %v532_v44, %v3328_v47  ;;  %v541_v35 = vmul.f32 %v529_v30, %v3334_v52  ;;  %v544_v61 = vmul.f32 %v532_v44, %v3340_v58  ;;  %v3365_v30 = vld [vmem:[#allocation5 + $0x68] sm:$0xff] }
 0x472   :  { %v548_v11 = vmul.f32 %v532_v44, %v3352_v7 }
 0x473   :  { %v2774_v48 = vpack.c.bf16 %v536_v46, %v535_v45  ;;  %v2782_v57 = vpack.c.bf16 %v540_v50, %v539_v54  ;;  %v2786_v62 = vpack.c.bf16 %v542_v59, %v541_v35  ;;  %v2790_v6 = vpack.c.bf16 %v544_v61, %v543_v0 }
 0x474   :  { %v2798_v17 = vpack.c.bf16 %v548_v11, %v547_v16 }
 0x475   :  { %2775 = vmatprep.subr.bf16.mxu1 %v2774_v48 }
 0x476   :  { %2777 = vmatpush3.bf16.msra.mxu1 %v2774_v48 }
 0x477   :  { %2779 = vmatprep.subr.bf16.mxu1 %v2778_v51 }
 0x47a   :  { %2781 = vmatpush3.bf16.msra.mxu1 %v2778_v51 }
 0x47b   :  { %2783 = vmatprep.subr.bf16.mxu1 %v2782_v57 }
 0x47e   :  { %2785 = vmatpush3.bf16.msra.mxu1 %v2782_v57 }
 0x47f   :  { %2787 = vmatprep.subr.bf16.mxu1 %v2786_v62 }
 0x482   :  { %2789 = vmatpush3.bf16.msra.mxu1 %v2786_v62 }
 0x483   :  { %2791 = vmatprep.subr.bf16.mxu1 %v2790_v6 }
 0x486   :  { %2793 = vmatpush3.bf16.msra.mxu1 %v2790_v6 }
 0x487   :  { %2795 = vmatprep.subr.bf16.mxu1 %v2794_v13 }
 0x48a   :  { %2797 = vmatpush3.bf16.msra.mxu1 %v2794_v13 }
 0x48b   :  { %2799 = vmatprep.subr.bf16.mxu1 %v2798_v17 }
 0x48e   :  { %2801 = vmatpush3.bf16.msra.mxu1 %v2798_v17 }
 0x540   :  { %v2532_v20 = vpop.f32.mrb[2].mxu0 }
 0x541   :  { %v484_v24 = vadd.f32 %v2532_v20, %v3359_v18  ;;  %v478_v27 = vpop.f32.mrb[3].mxu0 }
 0x542   :  { %v479_v29 = vadd.f32 %v478_v27, %v3361_v19 }
 0x543   :  { %499 = vmax.xlane.f32.xlu1 %v484_v24 }
 0x544   :  { %v2535_v32 = vpop.f32.mrb[4].mxu0  ;;  %497 = vmax.xlane.f32.xlu0 %v479_v29 }
 0x545   :  { %v488_v33 = vpop.f32.mrb[5].mxu0  ;;  %v494_v40 = vadd.f32 %v2535_v32, %v3368_v36 }
 0x546   :  { %v489_v34 = vadd.f32 %v488_v33, %v3365_v30 }
 0x548   :  { %501 = vmax.xlane.f32.xlu0 %v489_v34 }
 0x54c   :  { %503 = vmax.xlane.f32.xlu0 %v494_v40 }
 0x562   :  { %2940 = vrot.lane.b32.xlu0 %v2939_v5, %s3159_s8  ;;  %v2944_v5 = vpack.i.bf16 %v3222_v15, %v3220_v14 }
 0x564   :  { %2945 = vrot.lane.b32.xlu1 %v2944_v5, %s3159_s8 }
 0x5d0   :  { %v500_v42 = vpop.xlane.xlu1 %499 }
 0x5d1   :  { %v506_v44 = vsub.f32 %v484_v24, %v500_v42  ;;  %v498_v31 = vpop.xlane.xlu0 %497 }
 0x5d2   :  { %v505_v45 = vsub.f32 %v479_v29, %v498_v31 }
 0x5d3   :  { %v511_v46 = vmul.f32 1.442695, %v506_v44 }
 0x5d4   :  { %v509_v37 = vmul.f32 1.442695, %v505_v45 }
 0x5d5   :  { %v502_v48 = vpop.xlane.xlu0 %501 }
 0x5d6   :  { %2999 = vpow2.f32 %v509_v37  ;;  %v507_v50 = vsub.f32 %v489_v34, %v502_v48  ;;  %v2946_v8 = vpop.permute.xlu1 %2945 }
 0x5d7   :  { %3001 = vpow2.f32 %v511_v46  ;;  %v2948_v13 = vunpack.i.h.bf16 %v2946_v8  ;;  %v2947_v16 = vunpack.i.l.bf16 %v2946_v8 }
 0x5d8   :  { %v513_v51 = vmul.f32 1.442695, %v507_v50 }
 0x5d9   :  { %v504_v54 = vpop.xlane.xlu0 %503  ;;  %v2806_v24 = vpack.c.bf16 %v2948_v13, %v2947_v16 }
 0x5da   :  { %3003 = vpow2.f32 %v513_v51  ;;  %v508_v35 = vsub.f32 %v494_v40, %v504_v54  ;;  %v2320_v54 = vld [vmem:[#allocation5 + $0x159] ss:$0 sm:$0xff] }
 0x5dc   :  { %v515_v57 = vmul.f32 1.442695, %v508_v35 }
 0x5dd   :  { %v2941_v62 = vpop.permute.xlu0 %2940 }
 0x5de   :  { %3005 = vpow2.f32 %v515_v57  ;;  %v2943_v0 = vunpack.i.h.bf16 %v2941_v62  ;;  %v2942_v2 = vunpack.i.l.bf16 %v2941_v62 }
 0x5e0   :  { %v3000_v59 = vpop.eup %2999  ;;  %v2802_v6 = vpack.c.bf16 %v2943_v0, %v2942_v2 }
 0x5e1   :  { %v3002_v61 = vpop.eup %3001  ;;  %2568 = vmatprep.mubr.f32.mxu1 %v3000_v59 }
 0x5e2   :  { %2569 = vmatmul.mubr.f32.vlgmr.msra.gmra.mrb[4].mxu1 %v3002_v61  ;;  %2803 = vmatprep.subr.bf16.mxu0 %v2802_v6 }
 0x5e3   :  { %2805 = vmatpush3.bf16.msra.mxu0 %v2802_v6 }
 0x5e4   :  { %v3004_v3 = vpop.eup %3003  ;;  %2807 = vmatprep.subr.bf16.mxu0 %v2806_v24 }
 0x5e5   :  { %2571 = vmatprep.mubr.f32.mxu1 %v3004_v3 }
 0x5e7   :  { %2809 = vmatpush3.bf16.msra.mxu0 %v2806_v24 }
 0x5e8   :  { %v3006_v4 = vpop.eup %3005 }
 0x5e9   :  { %2572 = vmatmul.mubr.f32.gmra.mrb[6].mxu1 %v3006_v4 }
 0x6b5   :  { %v2570_v11 = vpop.f32.mrb[4].mxu1 }
 0x6b6   :  { %v635_v17 = vmax.f32 %v2570_v11, 1e-20  ;;  %v615_v20 = vpop.f32.mrb[5].mxu1 }
 0x6b7   :  { %v634_v27 = vmax.f32 %v615_v20, 1e-20 }
 0x6b8   :  { %3007 = vrcp.f32 %v635_v17 }
 0x6b9   :  { %3009 = vrcp.f32 %v634_v27 }
 0x6bc   :  { %v2573_v14 = vpop.f32.mrb[6].mxu1 }
 0x6bd   :  { %v637_v15 = vmax.f32 %v2573_v14, 1e-20  ;;  %v625_v29 = vpop.f32.mrb[7].mxu1 }
 0x6be   :  { %v636_v32 = vmax.f32 %v625_v29, 1e-20 }
 0x6bf   :  { %3011 = vrcp.f32 %v637_v15 }
 0x6c0   :  { %3013 = vrcp.f32 %v636_v32 }
 0x6c2   :  { %v3008_v33 = vpop.eup %3007 }
 0x6c3   :  { %648 = vrot.lane.b32.xlu0 %v3008_v33, %s3157_s1  ;;  %v3010_v34 = vpop.eup %3009 }
 0x6c7   :  { %646 = vrot.lane.b32.xlu0 %v3010_v34, %s3157_s1 }
 0x6c9   :  { %v3012_v40 = vpop.eup %3011 }
 0x6ca   :  { %v3014_v42 = vpop.eup %3013  ;;  %652 = vrot.lane.b32.xlu1 %v3012_v40, %s3157_s1 }
 0x6cb   :  { %650 = vrot.lane.b32.xlu0 %v3014_v42, %s3157_s1 }
 0x735   :  { %v649_v44 = vpop.permute.xlu0 %648 }
 0x736   :  { %v659_v46 = vmul.f32 %v2570_v11, %v649_v44 }
 0x739   :  { %v647_v31 = vpop.permute.xlu0 %646 }
 0x73a   :  { %v658_v45 = vmul.f32 %v647_v31, %v615_v20 }
 0x73c   :  { %v653_v37 = vpop.permute.xlu1 %652  ;;  %2582 = vmatprep.mubr.msk.f32.mxu0 %vm200_vm1, %v658_v45 }
 0x73d   :  { %v651_v48 = vpop.permute.xlu0 %650  ;;  %2583 = vmatmul.mubr.msk.f32.vlgmr.msra.gmra.mrb[6].mxu0 %vm200_vm1, %v659_v46  ;;  %v661_v51 = vmul.f32 %v2573_v14, %v653_v37 }
 0x73e   :  { %v660_v50 = vmul.f32 %v651_v48, %v625_v29  ;;  %v184_v48 = vld [vmem:[#allocation5 + $0x138] sm:$0xff] }
 0x740   :  { %2585 = vmatprep.mubr.msk.f32.mxu0 %vm200_vm1, %v660_v50  ;;  %v185_v50 = vld [vmem:[#allocation5 + $0x140] sm:$0xff] }
 0x741   :  { %2586 = vmatmul.mubr.msk.f32.gmra.mrb[8].mxu0 %vm200_vm1, %v661_v51  ;;  %v2810_v51 = vpack.c.bf16 %v185_v50, %v184_v48 }
 0x743   :  { %2811 = vmatprep.subr.bf16.mxu0 %v2810_v51 }
 0x744   :  { %2813 = vmatpush3.bf16.msra.mxu0 %v2810_v51 }
 0x810   :  { %v2584_v35 = vpop.f32.mrb[6].mxu0 }
 0x811   :  { %v766_v57 = vadd.f32 %v2584_v35, %v2320_v54  ;;  %v760_v59 = vpop.f32.mrb[7].mxu0  ;;  %v186_v35 = vld [vmem:[#allocation5 + $0x148] sm:$0xff] }
 0x812   :  { %v761_v61 = vadd.f32 %v2320_v54, %v760_v59 }
 0x813   :  { %v780_v3 = vadd.f32 %v766_v57, %v3229_v22  ;;  %v187_v57 = vld [vmem:[#allocation5 + $0x150] sm:$0xff] }
 0x814   :  { %v2587_v4 = vpop.f32.mrb[8].mxu0  ;;  %v779_v5 = vadd.f32 %v761_v61, %v3227_v21  ;;  %v2814_v59 = vpack.c.bf16 %v187_v57, %v186_v35  ;;  %v2949_v61 = vpack.i.bf16 %v185_v50, %v184_v48 }
 0x815   :  { %v770_v62 = vpop.f32.mrb[9].mxu0  ;;  %v786_v0 = vsel %vm200_vm1, %v780_v3, 0.0  ;;  %v776_v2 = vadd.f32 %v2587_v4, %v2320_v54  ;;  %v189_v4 = vld [vmem:[#allocation5 + $0x160] sm:$0xff] }
 0x816   :  { %v771_v6 = vadd.f32 %v2320_v54, %v770_v62  ;;  %787 = vadd.xlane.f32.xlu1 %v786_v0  ;;  %v783_v8 = vsel %vm200_vm1, %v779_v5, 0.0  ;;  %2815 = vmatprep.subr.bf16.mxu0 %v2814_v59  ;;  %v2954_v62 = vpack.i.bf16 %v187_v57, %v186_v35  ;;  %v191_v0 = vld [vmem:[#allocation5 + $0x170] sm:$0xff] }
 0x817   :  { %784 = vadd.xlane.f32.xlu0 %v783_v8  ;;  %v782_v16 = vadd.f32 %v776_v2, %v3240_v28  ;;  %2817 = vmatpush3.bf16.msra.mxu0 %v2814_v59 }
 0x818   :  { %v781_v11 = vadd.f32 %v771_v6, %v3236_v25 }
 0x819   :  { %v792_v22 = vsel %vm200_vm1, %v782_v16, 0.0 }
 0x81a   :  { %v789_v13 = vsel %vm200_vm1, %v781_v11, 0.0 }
 0x81b   :  { %790 = vadd.xlane.f32.xlu0 %v789_v13 }
 0x81f   :  { %793 = vadd.xlane.f32.xlu0 %v792_v22 }
 0x8a3   :  { %v788_v21 = vpop.xlane.xlu1 %787 }
 0x8a4   :  { %v797_v17 = vmul.f32 0.03125, %v788_v21  ;;  %v785_v20 = vpop.xlane.xlu0 %784 }
 0x8a5   :  { %v796_v24 = vmul.f32 0.03125, %v785_v20 }
 0x8a6   :  { %v3394_v27 = vsub.f32 %v780_v3, %v797_v17  ;;  %v188_v3 = vld [vmem:[#allocation5 + $0x158] sm:$0xff] }
 0x8a7   :  { %v3396_v14 = vsub.f32 %v779_v5, %v796_v24  ;;  %v2959_v5 = vpack.i.bf16 %v189_v4, %v188_v3 }
 0x8a8   :  { %v791_v15 = vpop.xlane.xlu0 %790  ;;  %v805_v25 = vmul.f32 %v3394_v27, %v3394_v27 }
 0x8a9   :  { %v798_v29 = vmul.f32 0.03125, %v791_v15  ;;  %v804_v28 = vmul.f32 %v3396_v14, %v3396_v14 }
 0x8aa   :  { %v811_v32 = vsel %vm200_vm1, %v805_v25, 0.0 }
 0x8ab   :  { %v802_v33 = vsub.f32 %v781_v11, %v798_v29  ;;  %812 = vadd.xlane.f32.xlu1 %v811_v32  ;;  %v808_v34 = vsel %vm200_vm1, %v804_v28, 0.0 }
 0x8ac   :  { %809 = vadd.xlane.f32.xlu0 %v808_v34  ;;  %v794_v40 = vpop.xlane.xlu0 %793 }
 0x8ad   :  { %v799_v42 = vmul.f32 0.03125, %v794_v40  ;;  %v806_v44 = vmul.f32 %v802_v33, %v802_v33 }
 0x8af   :  { %v803_v31 = vsub.f32 %v782_v16, %v799_v42  ;;  %v814_v45 = vsel %vm200_vm1, %v806_v44, 0.0 }
 0x8b0   :  { %815 = vadd.xlane.f32.xlu0 %v814_v45 }
 0x8b1   :  { %v807_v46 = vmul.f32 %v803_v31, %v803_v31 }
 0x8b3   :  { %v817_v37 = vsel %vm200_vm1, %v807_v46, 0.0 }
 0x8b4   :  { %818 = vadd.xlane.f32.xlu1 %v817_v37 }
 0x8c5   :  { %844 = vrot.lane.b32.xlu1 %v2320_v54, %s3158_s7 }
 0x8c6   :  { %837 = vrot.lane.b32.xlu0 %v2320_v54, %s3157_s1  ;;  %v190_v54 = vld [vmem:[#allocation5 + $0x168] sm:$0xff] }
 0x8c7   :  { %v2964_v2 = vpack.i.bf16 %v191_v0, %v190_v54 }
 0x8c9   :  { %2950 = vrot.lane.b32.xlu1 %v2949_v61, %s3159_s8 }
 0x8ca   :  { %2960 = vrot.lane.b32.xlu0 %v2959_v5, %s3159_s8 }
 0x8cd   :  { %2955 = vrot.lane.b32.xlu1 %v2954_v62, %s3159_s8 }
 0x8d1   :  { %2965 = vrot.lane.b32.xlu1 %v2964_v2, %s3159_s8 }
 0x938   :  { %v813_v6 = vpop.xlane.xlu1 %812 }
 0x939   :  { %v821_v8 = vmul.f32 0.03125, %v813_v6  ;;  %v810_v11 = vpop.xlane.xlu0 %809 }
 0x93a   :  { %v820_v13 = vmul.f32 0.03125, %v810_v11 }
 0x93b   :  { %v825_v16 = vadd.f32 1e-05, %v821_v8 }
 0x93c   :  { %v824_v22 = vadd.f32 1e-05, %v820_v13 }
 0x93d   :  { %3015 = vrsqrt.f32 %v825_v16  ;;  %v816_v21 = vpop.xlane.xlu0 %815 }
 0x93e   :  { %3017 = vrsqrt.f32 %v824_v22  ;;  %v822_v17 = vmul.f32 0.03125, %v816_v21  ;;  %v2325_v21 = vld [vmem:[#allocation5 + $0x15a] ss:$0 sm:$0xff] }
 0x940   :  { %v826_v20 = vadd.f32 1e-05, %v822_v17 }
 0x941   :  { %v819_v24 = vpop.xlane.xlu1 %818  ;;  %v838_v28 = vpop.permute.xlu0 %837 }
 0x942   :  { %3019 = vrsqrt.f32 %v826_v20  ;;  %v823_v15 = vmul.f32 0.03125, %v819_v24 }
 0x944   :  { %v827_v25 = vadd.f32 1e-05, %v823_v15 }
 0x945   :  { %v845_v44 = vpop.permute.xlu1 %844  ;;  %v2961_v0 = vpop.permute.xlu0 %2960 }
 0x946   :  { %3021 = vrsqrt.f32 %v827_v25  ;;  %v2963_v2 = vunpack.i.h.bf16 %v2961_v0  ;;  %v2962_v6 = vunpack.i.l.bf16 %v2961_v0 }
 0x947   :  { %v3016_v29 = vpop.eup %3015 }
 0x948   :  { %v3018_v32 = vpop.eup %3017  ;;  %v833_v34 = vmul.f32 %v3016_v29, %v3394_v27  ;;  %v2826_v8 = vpack.c.bf16 %v2963_v2, %v2962_v6  ;;  %v2330_v2 = vld [vmem:[#allocation5 + $0x15b] ss:$0 sm:$0xff] }
 0x949   :  { %v832_v40 = vmul.f32 %v3018_v32, %v3396_v14  ;;  %v2951_v59 = vpop.permute.xlu1 %2950 }
 0x94a   :  { %v841_v42 = vmul.f32 %v838_v28, %v833_v34  ;;  %v2953_v61 = vunpack.i.h.bf16 %v2951_v59  ;;  %v2952_v3 = vunpack.i.l.bf16 %v2951_v59 }
 0x94b   :  { %v840_v45 = vmul.f32 %v838_v28, %v832_v40 }
 0x94c   :  { %v3020_v46 = vpop.eup %3019  ;;  %v3416_v50 = vadd.f32 %v845_v44, %v841_v42  ;;  %v2818_v4 = vpack.c.bf16 %v2953_v61, %v2952_v3 }
 0x94d   :  { %v834_v37 = vmul.f32 %v3020_v46, %v802_v33  ;;  %v3414_v48 = vadd.f32 %v845_v44, %v840_v45  ;;  %v2956_v5 = vpop.permute.xlu1 %2955 }
 0x94e   :  { %v2958_v62 = vunpack.i.h.bf16 %v2956_v5  ;;  %v2957_v54 = vunpack.i.l.bf16 %v2956_v5  ;;  %2819 = vmatprep.subr.bf16.mxu0 %v2818_v4 }
 0x94f   :  { %v842_v51 = vmul.f32 %v838_v28, %v834_v37  ;;  %2596 = vmatprep.mubr.msk.f32.mxu0 %vm200_vm1, %v3414_v48 }
 0x950   :  { %v3022_v35 = vpop.eup %3021  ;;  %2597 = vmatmul.mubr.msk.f32.vlgmr.msra.gmra.mrb[10].mxu0 %vm200_vm1, %v3416_v50 }
 0x951   :  { %v835_v27 = vmul.f32 %v3022_v35, %v803_v31  ;;  %v3422_v57 = vadd.f32 %v845_v44, %v842_v51  ;;  %2821 = vmatpush3.bf16.msra.mxu0 %v2818_v4  ;;  %v2822_v31 = vpack.c.bf16 %v2958_v62, %v2957_v54  ;;  %v2966_v11 = vpop.permute.xlu1 %2965 }
 0x952   :  { %v2968_v13 = vunpack.i.h.bf16 %v2966_v11  ;;  %v2967_v16 = vunpack.i.l.bf16 %v2966_v11 }
 0x953   :  { %v843_v14 = vmul.f32 %v838_v28, %v835_v27  ;;  %2599 = vmatprep.mubr.msk.f32.mxu0 %vm200_vm1, %v3422_v57  ;;  %2823 = vmatprep.subr.bf16.mxu0 %v2822_v31 }
 0x954   :  { %v2830_v22 = vpack.c.bf16 %v2968_v13, %v2967_v16 }
 0x955   :  { %v3426_v33 = vadd.f32 %v845_v44, %v843_v14  ;;  %2825 = vmatpush3.bf16.msra.mxu0 %v2822_v31 }
 0x956   :  { %2827 = vmatprep.subr.bf16.mxu0 %v2826_v8 }
 0x957   :  { %2600 = vmatmul.mubr.msk.f32.gmra.mrb[12].mxu0 %vm200_vm1, %v3426_v33 }
 0x959   :  { %2829 = vmatpush3.bf16.msra.mxu0 %v2826_v8 }
 0x95a   :  { %2831 = vmatprep.subr.bf16.mxu0 %v2830_v22 }
 0x95d   :  { %2833 = vmatpush3.bf16.msra.mxu0 %v2830_v22 }
 0xa23   :  { %v2598_v17 = vpop.f32.mrb[10].mxu0 }
 0xa24   :  { %v939_v20 = vadd.f32 %v2598_v17, %v2325_v21  ;;  %v933_v24 = vpop.f32.mrb[11].mxu0 }
 0xa25   :  { %v934_v15 = vadd.f32 %v2325_v21, %v933_v24 }
 0xa26   :  { %v957_v25 = vmul.f32 0.70710677, %v939_v20  ;;  %v953_v27 = vmul.f32 0.5, %v939_v20 }
 0xa27   :  { %v956_v29 = vmul.f32 0.70710677, %v934_v15  ;;  %v952_v51 = vmul.f32 0.5, %v934_v15 }
 0xa28   :  { %3023 = verf.f32 %v957_v25 }
 0xa29   :  { %3025 = verf.f32 %v956_v29 }
 0xa2a   :  { %v2601_v28 = vpop.f32.mrb[12].mxu0 }
 0xa2b   :  { %v949_v32 = vadd.f32 %v2601_v28, %v2325_v21  ;;  %v943_v34 = vpop.f32.mrb[13].mxu0 }
 0xa2c   :  { %v944_v40 = vadd.f32 %v2325_v21, %v943_v34 }
 0xa2d   :  { %v959_v42 = vmul.f32 0.70710677, %v949_v32  ;;  %v955_v54 = vmul.f32 0.5, %v949_v32 }
 0xa2e   :  { %v958_v44 = vmul.f32 0.70710677, %v944_v40  ;;  %v954_v5 = vmul.f32 0.5, %v944_v40 }
 0xa2f   :  { %3027 = verf.f32 %v959_v42 }
 0xa30   :  { %3029 = verf.f32 %v958_v44 }
 0xa32   :  { %v3024_v45 = vpop.eup %3023 }
 0xa33   :  { %v3026_v46 = vpop.eup %3025  ;;  %v965_v37 = vadd.f32 1.0, %v3024_v45 }
 0xa34   :  { %v964_v35 = vadd.f32 1.0, %v3026_v46 }
 0xa35   :  { %v969_v59 = vmul.f32 %v965_v37, %v953_v27 }
 0xa36   :  { %v968_v14 = vmul.f32 %v964_v35, %v952_v51 }
 0xa38   :  { %2618 = vmatprep.mubr.msk.f32.mxu0 %vm390_vm2, %v968_v14 }
 0xa39   :  { %v3028_v61 = vpop.eup %3027  ;;  %2619 = vmatmul.mubr.msk.f32.vlgmr.msra.gmra.mrb[14].mxu0 %vm390_vm2, %v969_v59 }
 0xa3a   :  { %v3030_v3 = vpop.eup %3029  ;;  %v967_v4 = vadd.f32 1.0, %v3028_v61 }
 0xa3b   :  { %v966_v62 = vadd.f32 1.0, %v3030_v3 }
 0xa3c   :  { %v971_v0 = vmul.f32 %v967_v4, %v955_v54  ;;  %v3446_v54 = vld [vmem:[#allocation5 + $0x178] sm:$0xff] }
 0xa3d   :  { %v970_v31 = vmul.f32 %v966_v62, %v954_v5 }
 0xa3f   :  { %2621 = vmatprep.mubr.msk.f32.mxu0 %vm390_vm2, %v970_v31  ;;  %v3448_v31 = vld [vmem:[#allocation5 + $0x180] sm:$0xff] }
 0xa40   :  { %2622 = vmatmul.mubr.msk.f32.gmra.mrb[16].mxu0 %vm390_vm2, %v971_v0  ;;  %v2834_v0 = vpack.c.bf16 %v3448_v31, %v3446_v54 }
 0xa42   :  { %2835 = vmatprep.subr.bf16.mxu1 %v2834_v0 }
 0xa43   :  { %2837 = vmatpush3.bf16.msra.mxu1 %v2834_v0 }
 0xb0c   :  { %v2620_v6 = vpop.f32.mrb[14].mxu0 }
 0xb0d   :  { %v1092_v8 = vadd.f32 %v2620_v6, %v2330_v2  ;;  %v1086_v11 = vpop.f32.mrb[15].mxu0  ;;  %v3454_v6 = vld [vmem:[#allocation5 + $0x188] sm:$0xff] }
 0xb0e   :  { %v1087_v13 = vadd.f32 %v2330_v2, %v1086_v11 }
 0xb0f   :  { %v1106_v16 = vadd.f32 %v1092_v8, %v3416_v50  ;;  %v3456_v8 = vld [vmem:[#allocation5 + $0x190] sm:$0xff] }
 0xb10   :  { %v1105_v22 = vadd.f32 %v1087_v13, %v3414_v48  ;;  %v2838_v11 = vpack.c.bf16 %v3456_v8, %v3454_v6 }
 0xb11   :  { %v1112_v21 = vsel %vm200_vm1, %v1106_v16, 0.0 }
 0xb12   :  { %1113 = vadd.xlane.f32.xlu1 %v1112_v21  ;;  %v1109_v17 = vsel %vm200_vm1, %v1105_v22, 0.0  ;;  %2839 = vmatprep.subr.bf16.mxu1 %v2838_v11 }
 0xb13   :  { %v2623_v20 = vpop.f32.mrb[16].mxu0  ;;  %1110 = vadd.xlane.f32.xlu0 %v1109_v17  ;;  %2841 = vmatpush3.bf16.msra.mxu1 %v2838_v11 }
 0xb14   :  { %v1096_v24 = vpop.f32.mrb[17].mxu0  ;;  %v1102_v15 = vadd.f32 %v2623_v20, %v2330_v2 }
 0xb15   :  { %v1097_v25 = vadd.f32 %v2330_v2, %v1096_v24 }
 0xb16   :  { %v1108_v32 = vadd.f32 %v1102_v15, %v3426_v33 }
 0xb17   :  { %v1107_v29 = vadd.f32 %v1097_v25, %v3422_v57 }
 0xb18   :  { %v1118_v50 = vsel %vm200_vm1, %v1108_v32, 0.0 }
 0xb19   :  { %v1115_v28 = vsel %vm200_vm1, %v1107_v29, 0.0 }
 0xb1a   :  { %1116 = vadd.xlane.f32.xlu0 %v1115_v28 }
 0xb1e   :  { %1119 = vadd.xlane.f32.xlu0 %v1118_v50 }
 0xb9f   :  { %v1114_v48 = vpop.xlane.xlu1 %1113 }
 0xba0   :  { %v1122_v34 = vmul.f32 0.03125, %v1114_v48  ;;  %v1111_v40 = vpop.xlane.xlu0 %1110 }
 0xba1   :  { %v1121_v42 = vmul.f32 0.03125, %v1111_v40 }
 0xba2   :  { %v1126_v44 = vsub.f32 %v1106_v16, %v1122_v34 }
 0xba3   :  { %v1125_v45 = vsub.f32 %v1105_v22, %v1121_v42 }
 0xba4   :  { %v1130_v46 = vmul.f32 %v1126_v44, %v1126_v44 }
 0xba5   :  { %v1129_v37 = vmul.f32 %v1125_v45, %v1125_v45 }
 0xba6   :  { %v1136_v51 = vsel %vm200_vm1, %v1130_v46, 0.0 }
 0xba7   :  { %1137 = vadd.xlane.f32.xlu1 %v1136_v51  ;;  %v1117_v57 = vpop.xlane.xlu0 %1116  ;;  %v1133_v35 = vsel %vm200_vm1, %v1129_v37, 0.0 }
 0xba8   :  { %v1123_v27 = vmul.f32 0.03125, %v1117_v57  ;;  %1134 = vadd.xlane.f32.xlu0 %v1133_v35 }
 0xbaa   :  { %v1127_v33 = vsub.f32 %v1107_v29, %v1123_v27 }
 0xbab   :  { %v1120_v14 = vpop.xlane.xlu0 %1119 }
 0xbac   :  { %v1124_v59 = vmul.f32 0.03125, %v1120_v14  ;;  %v1131_v61 = vmul.f32 %v1127_v33, %v1127_v33 }
 0xbae   :  { %v1128_v3 = vsub.f32 %v1108_v32, %v1124_v59  ;;  %v1139_v4 = vsel %vm200_vm1, %v1131_v61, 0.0 }
 0xbaf   :  { %1140 = vadd.xlane.f32.xlu0 %v1139_v4 }
 0xbb0   :  { %v1132_v5 = vmul.f32 %v1128_v3, %v1128_v3 }
 0xbb2   :  { %v1142_v62 = vsel %vm200_vm1, %v1132_v5, 0.0  ;;  %v2335_v5 = vld [vmem:[#allocation5 + $0x1b8] ss:$0 sm:$0xff] }
 0xbb3   :  { %1143 = vadd.xlane.f32.xlu1 %v1142_v62 }
 0xbc4   :  { %1169 = vrot.lane.b32.xlu1 %v2330_v2, %s3158_s7 }
 0xbc5   :  { %1162 = vrot.lane.b32.xlu0 %v2330_v2, %s3157_s1 }
 0xc34   :  { %v1138_v13 = vpop.xlane.xlu1 %1137 }
 0xc35   :  { %v1146_v16 = vmul.f32 0.03125, %v1138_v13  ;;  %v1135_v22 = vpop.xlane.xlu0 %1134 }
 0xc36   :  { %v1145_v21 = vmul.f32 0.03125, %v1135_v22 }
 0xc37   :  { %v1150_v17 = vadd.f32 1e-05, %v1146_v16 }
 0xc38   :  { %v1149_v20 = vadd.f32 1e-05, %v1145_v21 }
 0xc39   :  { %3031 = vrsqrt.f32 %v1150_v17 }
 0xc3a   :  { %3033 = vrsqrt.f32 %v1149_v20 }
 0xc3c   :  { %v1141_v2 = vpop.xlane.xlu0 %1140 }
 0xc3d   :  { %v1147_v24 = vmul.f32 0.03125, %v1141_v2 }
 0xc3f   :  { %v1151_v15 = vadd.f32 1e-05, %v1147_v24 }
 0xc40   :  { %v1144_v25 = vpop.xlane.xlu1 %1143  ;;  %v1163_v50 = vpop.permute.xlu0 %1162 }
 0xc41   :  { %3035 = vrsqrt.f32 %v1151_v15  ;;  %v1148_v29 = vmul.f32 0.03125, %v1144_v25 }
 0xc43   :  { %v3032_v28 = vpop.eup %3031  ;;  %v1152_v32 = vadd.f32 1e-05, %v1148_v29 }
 0xc44   :  { %v3034_v48 = vpop.eup %3033  ;;  %v1158_v34 = vmul.f32 %v3032_v28, %v1126_v44  ;;  %v1170_v46 = vpop.permute.xlu1 %1169 }
 0xc45   :  { %3037 = vrsqrt.f32 %v1152_v32  ;;  %v1157_v40 = vmul.f32 %v3034_v48, %v1125_v45 }
 0xc46   :  { %v1166_v42 = vmul.f32 %v1163_v50, %v1158_v34 }
 0xc47   :  { %v1165_v37 = vmul.f32 %v1163_v50, %v1157_v40 }
 0xc48   :  { %v3462_v57 = vadd.f32 %v1170_v46, %v1166_v42 }
 0xc49   :  { %v3460_v51 = vadd.f32 %v1170_v46, %v1165_v37 }
 0xc4b   :  { %v3036_v35 = vpop.eup %3035  ;;  %2632 = vmatprep.mubr.msk.f32.mxu1 %vm200_vm1, %v3460_v51 }
 0xc4c   :  { %v1159_v27 = vmul.f32 %v3036_v35, %v1127_v33  ;;  %2633 = vmatmul.mubr.msk.f32.vlgmr.msra.gmra.mrb[8].mxu1 %vm200_vm1, %v3462_v57 }
 0xc4e   :  { %v1167_v14 = vmul.f32 %v1163_v50, %v1159_v27 }
 0xc4f   :  { %v3038_v59 = vpop.eup %3037 }
 0xc50   :  { %v1160_v44 = vmul.f32 %v3038_v59, %v1128_v3  ;;  %v3468_v61 = vadd.f32 %v1170_v46, %v1167_v14 }
 0xc52   :  { %v1168_v45 = vmul.f32 %v1163_v50, %v1160_v44  ;;  %2635 = vmatprep.mubr.msk.f32.mxu1 %vm200_vm1, %v3468_v61 }
 0xc54   :  { %v3472_v4 = vadd.f32 %v1170_v46, %v1168_v45 }
 0xc56   :  { %2636 = vmatmul.mubr.msk.f32.gmra.mrb[10].mxu1 %vm200_vm1, %v3472_v4 }
 0xd1f   :  { %v2634_v62 = vpop.f32.mrb[8].mxu1 }
 0xd20   :  { %v1278_v33 = vpop.f32.mrb[9].mxu1  ;;  %v3478_v3 = vadd.f32 %v2634_v62, %v2335_v5 }
 0xd21   :  { %v1279_v0 = vadd.f32 %v2335_v5, %v1278_v33 }
 0xd23   :  { %1301 = vrot.lane.b32.xlu1 %v1279_v0, %s3157_s1  ;;  %2646 = vmatprep.mubr.msk.f32.mxu0 %vm200_vm1, %v1279_v0 }
 0xd27   :  { %1303 = vrot.lane.b32.xlu1 %v3478_v3, %s3157_s1 }
 0xd29   :  { %v2637_v11 = vpop.f32.mrb[10].mxu1 }
 0xd2a   :  { %v3482_v13 = vadd.f32 %v2637_v11, %v2335_v5  ;;  %v1288_v16 = vpop.f32.mrb[11].mxu1 }
 0xd2b   :  { %v3484_v22 = vadd.f32 %v2335_v5, %v1288_v16 }
 0xd2c   :  { %1307 = vrot.lane.b32.xlu1 %v3482_v13, %s3157_s1 }
 0xd2d   :  { %1305 = vrot.lane.b32.xlu0 %v3484_v22, %s3157_s1 }
 0xd95   :  { %v1302_v21 = vpop.permute.xlu1 %1301 }
 0xd96   :  { %1313 = vxpose.xlu0.b32.start [1/4] (short) (narrow) %v1302_v21, 32 }
 0xd99   :  { %v1304_v17 = vpop.permute.xlu1 %1303 }
 0xd9a   :  { %1314 = vxpose.xlu0.b32.cont [2/4] (short) (narrow) %v1304_v17, 32 }
 0xd9e   :  { %v1308_v2 = vpop.permute.xlu1 %1307 }
 0xd9f   :  { %v1306_v20 = vpop.permute.xlu0 %1305 }
 0xda0   :  { %1315 = vxpose.xlu0.b32.cont [3/4] (short) (narrow) %v1306_v20, 32 }
 0xda4   :  { %1316 = vxpose.xlu0.b32.end [4/4] (short) (narrow) %v1308_v2, 32 }
 0xe18   :  { %v1329_v24 = vpop.trf.xlu0 }
 0xe19   :  { %1349 = vrot.lane.b32.xlu1 %v1329_v24, %s3159_s8 }
 0xe1c   :  { %v1330_v15 = vpop.trf.xlu0 }
 0xe1d   :  { %1361 = vrot.lane.b32.xlu1 %v1329_v24, %s3158_s7 }
 0xe20   :  { %v1331_v25 = vpop.trf.xlu0 }
 0xe21   :  { %1373 = vrot.lane.b32.xlu1 %v1329_v24, %s3157_s1  ;;  %1377 = vrot.lane.b32.xlu0 %v1331_v25, %s3157_s1 }
 0xe24   :  { %v1332_v29 = vpop.trf.xlu0 }
 0xe25   :  { %1351 = vrot.lane.b32.xlu1 %v1330_v15, %s3159_s8 }
 0xe29   :  { %1363 = vrot.lane.b32.xlu1 %v1330_v15, %s3158_s7 }
 0xe2d   :  { %1375 = vrot.lane.b32.xlu1 %v1330_v15, %s3157_s1 }
 0xe31   :  { %1353 = vrot.lane.b32.xlu1 %v1331_v25, %s3159_s8 }
 0xe35   :  { %1365 = vrot.lane.b32.xlu1 %v1331_v25, %s3158_s7 }
 0xe39   :  { %1355 = vrot.lane.b32.xlu1 %v1332_v29, %s3159_s8 }
 0xe3d   :  { %1367 = vrot.lane.b32.xlu1 %v1332_v29, %s3158_s7 }
 0xe41   :  { %1379 = vrot.lane.b32.xlu1 %v1332_v29, %s3157_s1 }
 0xe45   :  { %1514 = vrot.lane.b32.xlu1 %v1279_v0, %s3158_s7 }
 0xe49   :  { %1516 = vrot.lane.b32.xlu1 %v3478_v3, %s3158_s7 }
 0xe4d   :  { %1518 = vrot.lane.b32.xlu1 %v3484_v22, %s3158_s7 }
 0xe51   :  { %1520 = vrot.lane.b32.xlu1 %v3482_v13, %s3158_s7 }
 0xe8b   :  { %v1350_v28 = vpop.permute.xlu1 %1349 }
 0xe8c   :  { %v1385_v40 = vsel %vm200_vm1, %v1329_v24, %v1350_v28 }
 0xe8f   :  { %v1362_v32 = vpop.permute.xlu1 %1361 }
 0xe90   :  { %v1389_v42 = vsel %vm390_vm2, %v1385_v40, %v1362_v32 }
 0xe93   :  { %v1374_v50 = vpop.permute.xlu1 %1373  ;;  %v1378_v21 = vpop.permute.xlu0 %1377 }
 0xe94   :  { %v1393_v46 = vsel %vm395_vm3, %v1389_v42, %v1374_v50 }
 0xe95   :  { %v1397_v59 = vmul.f32 %v1393_v46, %v3279_v53 }
 0xe97   :  { %v1352_v48 = vpop.permute.xlu1 %1351 }
 0xe98   :  { %v1386_v37 = vsel %vm200_vm1, %v1330_v15, %v1352_v48 }
 0xe9b   :  { %v1364_v34 = vpop.permute.xlu1 %1363 }
 0xe9c   :  { %v1390_v35 = vsel %vm390_vm2, %v1386_v37, %v1364_v34 }
 0xe9f   :  { %v1376_v27 = vpop.permute.xlu1 %1375 }
 0xea0   :  { %v1394_v14 = vsel %vm395_vm3, %v1390_v35, %v1376_v27 }
 0xea1   :  { %v1398_v44 = vmul.f32 %v1394_v14, %v3283_v56 }
 0xea3   :  { %v1354_v45 = vpop.permute.xlu1 %1353  ;;  %v2842_v5 = vpack.c.bf16 %v1398_v44, %v1397_v59 }
 0xea4   :  { %v1387_v0 = vsel %vm200_vm1, %v1331_v25, %v1354_v45 }
 0xea5   :  { %2843 = vmatprep.subr.bf16.mxu0 %v2842_v5 }
 0xea6   :  { %2845 = vmatpush3.bf16.msra.mxu0 %v2842_v5 }
 0xea7   :  { %v1366_v62 = vpop.permute.xlu1 %1365 }
 0xea8   :  { %v1391_v11 = vsel %vm390_vm2, %v1387_v0, %v1366_v62 }
 0xea9   :  { %v1395_v17 = vsel %vm395_vm3, %v1391_v11, %v1378_v21 }
 0xeaa   :  { %v1399_v24 = vmul.f32 %v1395_v17, %v3291_v9 }
 0xeab   :  { %v1356_v33 = vpop.permute.xlu1 %1355 }
 0xeac   :  { %v1388_v20 = vsel %vm200_vm1, %v1332_v29, %v1356_v33 }
 0xeaf   :  { %v1368_v16 = vpop.permute.xlu1 %1367 }
 0xeb0   :  { %v1392_v53 = vsel %vm390_vm2, %v1388_v20, %v1368_v16 }
 0xeb3   :  { %v1380_v2 = vpop.permute.xlu1 %1379 }
 0xeb4   :  { %v1396_v56 = vsel %vm395_vm3, %v1392_v53, %v1380_v2 }
 0xeb5   :  { %v1400_v15 = vmul.f32 %v1396_v56, %v3295_v12 }
 0xeb7   :  { %v1515_v28 = vpop.permute.xlu1 %1514  ;;  %v2846_v32 = vpack.c.bf16 %v1400_v15, %v1399_v24 }
 0xeb8   :  { %v1526_v25 = vsel %vm200_vm1, %v1515_v28, 1.0 }
 0xeb9   :  { %2847 = vmatprep.subr.bf16.mxu0 %v2846_v32  ;;  %v1530_v29 = vmul.f32 %v1526_v25, %v3304_v26 }
 0xeba   :  { %2849 = vmatpush3.bf16.msra.mxu0 %v2846_v32  ;;  %v2969_v32 = vpack.i.bf16 %v3448_v31, %v3446_v54 }
 0xebb   :  { %v1517_v50 = vpop.permute.xlu1 %1516 }
 0xebc   :  { %v1527_v48 = vsel %vm200_vm1, %v1517_v50, 1.0 }
 0xebd   :  { %v1531_v34 = vmul.f32 %v1527_v48, %v3301_v23  ;;  %2647 = vmatmul.mubr.msk.f32.vlgmr.msra.gmra.mrb[18].mxu0 %vm200_vm1, %v3478_v3  ;;  %v1535_v23 = vmul.f32 %v1527_v48, %v3320_v43  ;;  %v1539_v14 = vmul.f32 %v1527_v48, %v3337_v55  ;;  %v1538_v43 = vmul.f32 %v1526_v25, %v3334_v52 }
 0xebe   :  { %2649 = vmatprep.mubr.msk.f32.mxu0 %vm200_vm1, %v3484_v22  ;;  %v1534_v22 = vmul.f32 %v1526_v25, %v3311_v38 }
 0xebf   :  { %v1519_v9 = vpop.permute.xlu1 %1518  ;;  %v2850_v12 = vpack.c.bf16 %v1531_v34, %v1530_v29 }
 0xec0   :  { %v1528_v40 = vsel %vm200_vm1, %v1519_v9, 1.0 }
 0xec1   :  { %2650 = vmatmul.mubr.msk.f32.gmra.mrb[20].mxu0 %vm200_vm1, %v3482_v13  ;;  %2851 = vmatprep.subr.bf16.mxu1 %v2850_v12  ;;  %v1532_v46 = vmul.f32 %v1528_v40, %v3313_v39  ;;  %v2858_v13 = vpack.c.bf16 %v1535_v23, %v1534_v22  ;;  %v1536_v27 = vmul.f32 %v1528_v40, %v3331_v49 }
 0xec2   :  { %2853 = vmatpush3.bf16.msra.mxu1 %v2850_v12  ;;  %v1540_v38 = vmul.f32 %v1528_v40, %v3343_v60  ;;  %v1542_v49 = vmul.f32 %v1526_v25, %v3346_v63  ;;  %v1544_v52 = vmul.f32 %v1528_v40, %v3355_v10  ;;  %v2974_v25 = vpack.i.bf16 %v3456_v8, %v3454_v6 }
 0xec3   :  { %v1521_v42 = vpop.permute.xlu1 %1520 }
 0xec4   :  { %v1529_v26 = vsel %vm200_vm1, %v1521_v42, 1.0 }
 0xec5   :  { %v1533_v3 = vmul.f32 %v1529_v26, %v3318_v41  ;;  %v1537_v35 = vmul.f32 %v1529_v26, %v3328_v47  ;;  %v1541_v39 = vmul.f32 %v1529_v26, %v3340_v58  ;;  %v2866_v41 = vpack.c.bf16 %v1539_v14, %v1538_v43 }
 0xec6   :  { %v1543_v47 = vmul.f32 %v1527_v48, %v3349_v1  ;;  %v1545_v55 = vmul.f32 %v1529_v26, %v3352_v7 }
 0xec7   :  { %v2854_v37 = vpack.c.bf16 %v1533_v3, %v1532_v46  ;;  %v2862_v59 = vpack.c.bf16 %v1537_v35, %v1536_v27  ;;  %v2870_v44 = vpack.c.bf16 %v1541_v39, %v1540_v38 }
 0xec8   :  { %v2874_v45 = vpack.c.bf16 %v1543_v47, %v1542_v49  ;;  %v2878_v58 = vpack.c.bf16 %v1545_v55, %v1544_v52 }
 0xec9   :  { %2855 = vmatprep.subr.bf16.mxu1 %v2854_v37 }
 0xeca   :  { %2857 = vmatpush3.bf16.msra.mxu1 %v2854_v37 }
 0xecb   :  { %2859 = vmatprep.subr.bf16.mxu1 %v2858_v13 }
 0xece   :  { %2861 = vmatpush3.bf16.msra.mxu1 %v2858_v13 }
 0xecf   :  { %2863 = vmatprep.subr.bf16.mxu1 %v2862_v59 }
 0xed2   :  { %2865 = vmatpush3.bf16.msra.mxu1 %v2862_v59 }
 0xed3   :  { %2867 = vmatprep.subr.bf16.mxu1 %v2866_v41 }
 0xed6   :  { %2869 = vmatpush3.bf16.msra.mxu1 %v2866_v41 }
 0xed7   :  { %2871 = vmatprep.subr.bf16.mxu1 %v2870_v44 }
 0xeda   :  { %2873 = vmatpush3.bf16.msra.mxu1 %v2870_v44  ;;  %v2344_v44 = vld [vmem:[#allocation5 + $0x1b9] ss:$0 sm:$0xff] }
 0xedb   :  { %2875 = vmatprep.subr.bf16.mxu1 %v2874_v45 }
 0xede   :  { %2877 = vmatpush3.bf16.msra.mxu1 %v2874_v45 }
 0xedf   :  { %2879 = vmatprep.subr.bf16.mxu1 %v2878_v58 }
 0xee2   :  { %2881 = vmatpush3.bf16.msra.mxu1 %v2878_v58 }
 0xf90   :  { %v2648_v60 = vpop.f32.mrb[18].mxu0 }
 0xf91   :  { %v1481_v5 = vadd.f32 %v2648_v60, %v3359_v18  ;;  %v1475_v1 = vpop.f32.mrb[19].mxu0 }
 0xf92   :  { %v1476_v62 = vadd.f32 %v1475_v1, %v3361_v19 }
 0xf93   :  { %1496 = vmax.xlane.f32.xlu0 %v1481_v5 }
 0xf94   :  { %v2651_v63 = vpop.f32.mrb[20].mxu0  ;;  %1494 = vmax.xlane.f32.xlu1 %v1476_v62 }
 0xf95   :  { %v1485_v33 = vpop.f32.mrb[21].mxu0  ;;  %v1491_v10 = vadd.f32 %v2651_v63, %v3368_v36 }
 0xf96   :  { %v1486_v7 = vadd.f32 %v1485_v33, %v3365_v30 }
 0xf98   :  { %1498 = vmax.xlane.f32.xlu1 %v1486_v7 }
 0xf9c   :  { %1500 = vmax.xlane.f32.xlu1 %v1491_v10 }
 0xfa9   :  { %2975 = vrot.lane.b32.xlu0 %v2974_v25, %s3159_s8 }
 0xfad   :  { %2970 = vrot.lane.b32.xlu1 %v2969_v32, %s3159_s8 }
0x1020   :  { %v1497_v0 = vpop.xlane.xlu0 %1496 }
0x1021   :  { %v1503_v11 = vsub.f32 %v1481_v5, %v1497_v0  ;;  %v1495_v16 = vpop.xlane.xlu1 %1494 }
0x1022   :  { %v1502_v21 = vsub.f32 %v1476_v62, %v1495_v16 }
0x1023   :  { %v1508_v17 = vmul.f32 1.442695, %v1503_v11 }
0x1024   :  { %v1506_v20 = vmul.f32 1.442695, %v1502_v21  ;;  %v2976_v9 = vpop.permute.xlu0 %2975 }
0x1025   :  { %v1499_v18 = vpop.xlane.xlu1 %1498  ;;  %v2978_v40 = vunpack.i.h.bf16 %v2976_v9  ;;  %v2977_v42 = vunpack.i.l.bf16 %v2976_v9  ;;  %v1182_v9 = vld [vmem:[#allocation5 + $0x1a8] sm:$0xff] }
0x1026   :  { %3039 = vpow2.f32 %v1506_v20  ;;  %v1504_v53 = vsub.f32 %v1486_v7, %v1499_v18 }
0x1027   :  { %3041 = vpow2.f32 %v1508_v17  ;;  %v2886_v54 = vpack.c.bf16 %v2978_v40, %v2977_v42 }
0x1028   :  { %v1510_v19 = vmul.f32 1.442695, %v1504_v53 }
0x1029   :  { %v1501_v2 = vpop.xlane.xlu1 %1500 }
0x102a   :  { %3043 = vpow2.f32 %v1510_v19  ;;  %v1505_v56 = vsub.f32 %v1491_v10, %v1501_v2 }
0x102c   :  { %v1512_v24 = vmul.f32 1.442695, %v1505_v56 }
0x102d   :  { %v2971_v50 = vpop.permute.xlu1 %2970 }
0x102e   :  { %3045 = vpow2.f32 %v1512_v24  ;;  %v2973_v48 = vunpack.i.h.bf16 %v2971_v50  ;;  %v2972_v29 = vunpack.i.l.bf16 %v2971_v50 }
0x1030   :  { %v3040_v30 = vpop.eup %3039  ;;  %v2882_v34 = vpack.c.bf16 %v2973_v48, %v2972_v29  ;;  %v1180_v48 = vld [vmem:[#allocation5 + $0x198] sm:$0xff]  ;;  %v1181_v29 = vld [vmem:[#allocation5 + $0x1a0] sm:$0xff] }
0x1031   :  { %v3042_v15 = vpop.eup %3041  ;;  %2684 = vmatprep.mubr.f32.mxu1 %v3040_v30  ;;  %v2979_v42 = vpack.i.bf16 %v1181_v29, %v1180_v48 }
0x1032   :  { %2685 = vmatmul.mubr.f32.vlgmr.msra.gmra.mrb[12].mxu1 %v3042_v15  ;;  %2883 = vmatprep.subr.bf16.mxu0 %v2882_v34 }
0x1033   :  { %2885 = vmatpush3.bf16.msra.mxu0 %v2882_v34  ;;  %v2890_v34 = vpack.c.bf16 %v1181_v29, %v1180_v48 }
0x1034   :  { %v3044_v36 = vpop.eup %3043  ;;  %2887 = vmatprep.subr.bf16.mxu0 %v2886_v54 }
0x1035   :  { %2687 = vmatprep.mubr.f32.mxu1 %v3044_v36 }
0x1037   :  { %2889 = vmatpush3.bf16.msra.mxu0 %v2886_v54  ;;  %v1189_v54 = vld [vmem:[#allocation5 + $0x1c0] sm:$0xff] }
0x1038   :  { %v3046_v28 = vpop.eup %3045  ;;  %2891 = vmatprep.subr.bf16.mxu0 %v2890_v34 }
0x1039   :  { %2688 = vmatmul.mubr.f32.gmra.mrb[14].mxu1 %v3046_v28 }
0x1105   :  { %v2686_v12 = vpop.f32.mrb[12].mxu1 }
0x1106   :  { %v1632_v26 = vmax.f32 %v2686_v12, 1e-20  ;;  %v1612_v23 = vpop.f32.mrb[13].mxu1 }
0x1107   :  { %v1631_v31 = vmax.f32 %v1612_v23, 1e-20 }
0x1108   :  { %3047 = vrcp.f32 %v1632_v26 }
0x1109   :  { %3049 = vrcp.f32 %v1631_v31  ;;  %v1190_v31 = vld [vmem:[#allocation5 + $0x1c8] sm:$0xff] }
0x110c   :  { %v2689_v6 = vpop.f32.mrb[14].mxu1 }
0x110d   :  { %v1634_v8 = vmax.f32 %v2689_v6, 1e-20  ;;  %v1622_v46 = vpop.f32.mrb[15].mxu1 }
0x110e   :  { %v1633_v3 = vmax.f32 %v1622_v46, 1e-20 }
0x110f   :  { %3051 = vrcp.f32 %v1634_v8 }
0x1110   :  { %3053 = vrcp.f32 %v1633_v3 }
0x1112   :  { %v3048_v22 = vpop.eup %3047 }
0x1113   :  { %1645 = vrot.lane.b32.xlu1 %v3048_v22, %s3157_s1  ;;  %v3050_v37 = vpop.eup %3049 }
0x1117   :  { %1643 = vrot.lane.b32.xlu1 %v3050_v37, %s3157_s1 }
0x1119   :  { %v3052_v35 = vpop.eup %3051 }
0x111a   :  { %v3054_v13 = vpop.eup %3053  ;;  %1649 = vrot.lane.b32.xlu0 %v3052_v35, %s3157_s1 }
0x111b   :  { %1647 = vrot.lane.b32.xlu1 %v3054_v13, %s3157_s1 }
0x1185   :  { %v1646_v27 = vpop.permute.xlu1 %1645 }
0x1186   :  { %v1656_v43 = vmul.f32 %v2686_v12, %v1646_v27  ;;  %v1183_v12 = vld [vmem:[#allocation5 + $0x1b0] sm:$0xff] }
0x1187   :  { %v2894_v40 = vpack.c.bf16 %v1183_v12, %v1182_v9  ;;  %v2984_v26 = vpack.i.bf16 %v1183_v12, %v1182_v9 }
0x1189   :  { %v1644_v14 = vpop.permute.xlu1 %1643 }
0x118a   :  { %v1655_v59 = vmul.f32 %v1644_v14, %v1612_v23  ;;  %v1188_v23 = vld [vmem:[#allocation5 + $0x1b8] sm:$0xff] }
0x118b   :  { %v2989_v8 = vpack.i.bf16 %v1189_v54, %v1188_v23 }
0x118c   :  { %v1650_v39 = vpop.permute.xlu0 %1649  ;;  %2698 = vmatprep.mubr.msk.f32.mxu0 %vm200_vm1, %v1655_v59 }
0x118d   :  { %v1648_v41 = vpop.permute.xlu1 %1647  ;;  %2699 = vmatmul.mubr.msk.f32.vlgmr.msra.gmra.mrb[22].mxu0 %vm200_vm1, %v1656_v43  ;;  %v1658_v47 = vmul.f32 %v2689_v6, %v1650_v39  ;;  %v1191_v6 = vld [vmem:[#allocation5 + $0x1d0] sm:$0xff] }
0x118e   :  { %v1657_v38 = vmul.f32 %v1648_v41, %v1622_v46  ;;  %2893 = vmatpush3.bf16.msra.mxu0 %v2890_v34  ;;  %v2994_v46 = vpack.i.bf16 %v1191_v6, %v1190_v31 }
0x118f   :  { %2895 = vmatprep.subr.bf16.mxu0 %v2894_v40 }
0x1190   :  { %2701 = vmatprep.mubr.msk.f32.mxu0 %vm200_vm1, %v1657_v38 }
0x1191   :  { %2702 = vmatmul.mubr.msk.f32.gmra.mrb[24].mxu0 %vm200_vm1, %v1658_v47 }
0x1192   :  { %2897 = vmatpush3.bf16.msra.mxu0 %v2894_v40 }
0x1260   :  { %v2700_v49 = vpop.f32.mrb[22].mxu0 }
0x1261   :  { %v1763_v55 = vadd.f32 %v2700_v49, %v2344_v44  ;;  %v1757_v45 = vpop.f32.mrb[23].mxu0 }
0x1262   :  { %v1758_v52 = vadd.f32 %v2344_v44, %v1757_v45 }
0x1263   :  { %v1777_v58 = vadd.f32 %v1763_v55, %v3462_v57 }
0x1264   :  { %v2703_v60 = vpop.f32.mrb[24].mxu0  ;;  %v1776_v5 = vadd.f32 %v1758_v52, %v3460_v51 }
0x1265   :  { %v1773_v1 = vadd.f32 %v2703_v60, %v2344_v44  ;;  %v1767_v62 = vpop.f32.mrb[25].mxu0  ;;  %v1783_v63 = vsel %vm200_vm1, %v1777_v58, 0.0 }
0x1266   :  { %v1768_v33 = vadd.f32 %v2344_v44, %v1767_v62  ;;  %1784 = vadd.xlane.f32.xlu0 %v1783_v63  ;;  %v1780_v7 = vsel %vm200_vm1, %v1776_v5, 0.0 }
0x1267   :  { %v1779_v10 = vadd.f32 %v1773_v1, %v3472_v4  ;;  %1781 = vadd.xlane.f32.xlu1 %v1780_v7 }
0x1268   :  { %v1778_v0 = vadd.f32 %v1768_v33, %v3468_v61 }
0x1269   :  { %v1789_v11 = vsel %vm200_vm1, %v1779_v10, 0.0 }
0x126a   :  { %v1786_v57 = vsel %vm200_vm1, %v1778_v0, 0.0 }
0x126b   :  { %1787 = vadd.xlane.f32.xlu0 %v1786_v57  ;;  %1790 = vadd.xlane.f32.xlu1 %v1789_v11 }
0x12f3   :  { %v1785_v51 = vpop.xlane.xlu0 %1784 }
0x12f4   :  { %v1793_v16 = vmul.f32 0.03125, %v1785_v51  ;;  %v1782_v21 = vpop.xlane.xlu1 %1781 }
0x12f5   :  { %v1792_v17 = vmul.f32 0.03125, %v1782_v21 }
0x12f6   :  { %v3577_v20 = vsub.f32 %v1777_v58, %v1793_v16 }
0x12f7   :  { %v3579_v18 = vsub.f32 %v1776_v5, %v1792_v17 }
0x12f8   :  { %v1788_v53 = vpop.xlane.xlu0 %1787  ;;  %v1791_v19 = vpop.xlane.xlu1 %1790  ;;  %v1801_v4 = vmul.f32 %v3577_v20, %v3577_v20 }
0x12f9   :  { %v1794_v61 = vmul.f32 0.03125, %v1788_v53  ;;  %v1795_v2 = vmul.f32 0.03125, %v1791_v19  ;;  %v1800_v56 = vmul.f32 %v3579_v18, %v3579_v18 }
0x12fa   :  { %v1807_v24 = vsel %vm200_vm1, %v1801_v4, 0.0 }
0x12fb   :  { %v1798_v30 = vsub.f32 %v1778_v0, %v1794_v61  ;;  %v1799_v15 = vsub.f32 %v1779_v10, %v1795_v2  ;;  %1808 = vadd.xlane.f32.xlu1 %v1807_v24  ;;  %v1804_v36 = vsel %vm200_vm1, %v1800_v56, 0.0 }
0x12fc   :  { %1805 = vadd.xlane.f32.xlu0 %v1804_v36 }
0x12fd   :  { %v1802_v28 = vmul.f32 %v1798_v30, %v1798_v30  ;;  %v1803_v32 = vmul.f32 %v1799_v15, %v1799_v15 }
0x12ff   :  { %v1810_v25 = vsel %vm200_vm1, %v1802_v28, 0.0  ;;  %v1813_v50 = vsel %vm200_vm1, %v1803_v32, 0.0  ;;  %v2349_v28 = vld [vmem:[#allocation5 + $0x1ba] ss:$0 sm:$0xff] }
0x1300   :  { %1811 = vadd.xlane.f32.xlu0 %v1810_v25  ;;  %1814 = vadd.xlane.f32.xlu1 %v1813_v50 }
0x1311   :  { %1840 = vrot.lane.b32.xlu1 %v2344_v44, %s3158_s7 }
0x1315   :  { %2980 = vrot.lane.b32.xlu1 %v2979_v42, %s3159_s8 }
0x1316   :  { %1833 = vrot.lane.b32.xlu0 %v2344_v44, %s3157_s1 }
0x1319   :  { %2990 = vrot.lane.b32.xlu1 %v2989_v8, %s3159_s8 }
0x131a   :  { %2985 = vrot.lane.b32.xlu0 %v2984_v26, %s3159_s8 }
0x131e   :  { %2995 = vrot.lane.b32.xlu0 %v2994_v46, %s3159_s8 }
0x1388   :  { %v1809_v3 = vpop.xlane.xlu1 %1808 }
0x1389   :  { %v1817_v22 = vmul.f32 0.03125, %v1809_v3  ;;  %v1806_v37 = vpop.xlane.xlu0 %1805 }
0x138a   :  { %v1816_v35 = vmul.f32 0.03125, %v1806_v37 }
0x138b   :  { %v1821_v13 = vadd.f32 1e-05, %v1817_v22 }
0x138c   :  { %v1820_v27 = vadd.f32 1e-05, %v1816_v35 }
0x138d   :  { %3055 = vrsqrt.f32 %v1821_v13  ;;  %v1812_v14 = vpop.xlane.xlu0 %1811  ;;  %v1815_v59 = vpop.xlane.xlu1 %1814 }
0x138e   :  { %3057 = vrsqrt.f32 %v1820_v27  ;;  %v1818_v43 = vmul.f32 0.03125, %v1812_v14  ;;  %v1819_v39 = vmul.f32 0.03125, %v1815_v59 }
0x1390   :  { %v1822_v41 = vadd.f32 1e-05, %v1818_v43  ;;  %v1823_v38 = vadd.f32 1e-05, %v1819_v39 }
0x1391   :  { %v1834_v44 = vpop.permute.xlu0 %1833  ;;  %v1841_v58 = vpop.permute.xlu1 %1840 }
0x1392   :  { %3059 = vrsqrt.f32 %v1822_v41 }
0x1393   :  { %3061 = vrsqrt.f32 %v1823_v38 }
0x1395   :  { %v2981_v51 = vpop.permute.xlu1 %2980 }
0x1396   :  { %v2983_v16 = vunpack.i.h.bf16 %v2981_v51  ;;  %v2982_v21 = vunpack.i.l.bf16 %v2981_v51 }
0x1397   :  { %v3056_v47 = vpop.eup %3055 }
0x1398   :  { %v3058_v49 = vpop.eup %3057  ;;  %v1829_v55 = vmul.f32 %v3056_v47, %v3577_v20  ;;  %v2898_v17 = vpack.c.bf16 %v2983_v16, %v2982_v21  ;;  %v2986_v20 = vpop.permute.xlu0 %2985 }
0x1399   :  { %v1828_v45 = vmul.f32 %v3058_v49, %v3579_v18  ;;  %v2988_v18 = vunpack.i.h.bf16 %v2986_v20  ;;  %v2987_v53 = vunpack.i.l.bf16 %v2986_v20  ;;  %v2991_v4 = vpop.permute.xlu1 %2990 }
0x139a   :  { %v1837_v52 = vmul.f32 %v1834_v44, %v1829_v55  ;;  %2899 = vmatprep.subr.bf16.mxu0 %v2898_v17  ;;  %v2993_v61 = vunpack.i.h.bf16 %v2991_v4  ;;  %v2992_v2 = vunpack.i.l.bf16 %v2991_v4  ;;  %v2172_v4 = vld [vmem:[#allocation5 + $0x30] sm:$0xff] }
0x139b   :  { %v1836_v60 = vmul.f32 %v1834_v44, %v1828_v45  ;;  %v2902_v19 = vpack.c.bf16 %v2988_v18, %v2987_v53 }
0x139c   :  { %v3060_v5 = vpop.eup %3059  ;;  %v3599_v7 = vadd.f32 %v1841_v58, %v1837_v52  ;;  %v2906_v56 = vpack.c.bf16 %v2993_v61, %v2992_v2  ;;  %v2996_v24 = vpop.permute.xlu0 %2995  ;;  %v2173_v61 = vld [vmem:[#allocation5 + $0x38] sm:$0xff] }
0x139d   :  { %v3062_v1 = vpop.eup %3061  ;;  %v1830_v62 = vmul.f32 %v3060_v5, %v1798_v30  ;;  %v3597_v63 = vadd.f32 %v1841_v58, %v1836_v60  ;;  %v2998_v30 = vunpack.i.h.bf16 %v2996_v24  ;;  %v2914_v2 = vpack.c.bf16 %v2173_v61, %v2172_v4 }
0x139e   :  { %v1831_v33 = vmul.f32 %v3062_v1, %v1799_v15  ;;  %v2997_v15 = vunpack.i.l.bf16 %v2996_v24  ;;  %v2175_v24 = vld [vmem:[#allocation5 + $0x48] sm:$0xff] }
0x139f   :  { %v1838_v10 = vmul.f32 %v1834_v44, %v1830_v62  ;;  %2712 = vmatprep.mubr.msk.f32.mxu0 %vm200_vm1, %v3597_v63  ;;  %2922 = vmatprep.subr.bf16.mxu1 %v2914_v2 }
0x13a0   :  { %v1839_v0 = vmul.f32 %v1834_v44, %v1831_v33  ;;  %2713 = vmatmul.mubr.msk.f32.vlgmr.msra.gmra.mrb[26].mxu0 %vm200_vm1, %v3599_v7  ;;  %v2910_v36 = vpack.c.bf16 %v2998_v30, %v2997_v15  ;;  %v2354_v44 = vld [vmem:[#allocation5 + $0x1bb] ss:$0 sm:$0xff]  ;;  %2924 = vmatpush3.bf16.msra.mxu1 %v2914_v2 }
0x13a1   :  { %v3605_v11 = vadd.f32 %v1841_v58, %v1838_v10  ;;  %2901 = vmatpush3.bf16.msra.mxu0 %v2898_v17 }
0x13a2   :  { %v3607_v57 = vadd.f32 %v1841_v58, %v1839_v0  ;;  %2903 = vmatprep.subr.bf16.mxu0 %v2902_v19 }
0x13a3   :  { %2715 = vmatprep.mubr.msk.f32.mxu0 %vm200_vm1, %v3605_v11 }
0x13a4   :  { %2716 = vmatmul.mubr.msk.f32.gmra.mrb[28].mxu0 %vm200_vm1, %v3607_v57 }
0x13a5   :  { %2905 = vmatpush3.bf16.msra.mxu0 %v2902_v19 }
0x13a6   :  { %2907 = vmatprep.subr.bf16.mxu0 %v2906_v56 }
0x13a9   :  { %2909 = vmatpush3.bf16.msra.mxu0 %v2906_v56  ;;  %v2174_v56 = vld [vmem:[#allocation5 + $0x40] sm:$0xff] }
0x13aa   :  { %2911 = vmatprep.subr.bf16.mxu0 %v2910_v36  ;;  %v2918_v30 = vpack.c.bf16 %v2175_v24, %v2174_v56 }
0x13ac   :  { %2923 = vmatprep.subr.bf16.mxu1 %v2918_v30 }
0x13ad   :  { %2913 = vmatpush3.bf16.msra.mxu0 %v2910_v36  ;;  %2925 = vmatpush3.bf16.msra.mxu1 %v2918_v30 }
0x13ae   :  { %2915 = vmatprep.subr.bf16.mxu0 %v2914_v2 }
0x1473   :  { %v2714_v32 = vpop.f32.mrb[26].mxu0 }
0x1474   :  { %v1935_v25 = vadd.f32 %v2714_v32, %v2349_v28  ;;  %v1929_v50 = vpop.f32.mrb[27].mxu0 }
0x1475   :  { %v1930_v48 = vadd.f32 %v2349_v28, %v1929_v50 }
0x1476   :  { %v1953_v29 = vmul.f32 0.70710677, %v1935_v25  ;;  %v1949_v3 = vmul.f32 0.5, %v1935_v25 }
0x1477   :  { %v1952_v34 = vmul.f32 0.70710677, %v1930_v48  ;;  %v2717_v9 = vpop.f32.mrb[28].mxu0  ;;  %v1948_v8 = vmul.f32 0.5, %v1930_v48 }
0x1478   :  { %3063 = verf.f32 %v1953_v29  ;;  %v1945_v12 = vadd.f32 %v2717_v9, %v2349_v28  ;;  %v1939_v40 = vpop.f32.mrb[29].mxu0 }
0x1479   :  { %3065 = verf.f32 %v1952_v34  ;;  %v1940_v42 = vadd.f32 %v2349_v28, %v1939_v40 }
0x147a   :  { %v1955_v26 = vmul.f32 0.70710677, %v1945_v12  ;;  %v1951_v43 = vmul.f32 0.5, %v1945_v12 }
0x147b   :  { %v1954_v23 = vmul.f32 0.70710677, %v1940_v42  ;;  %v1950_v14 = vmul.f32 0.5, %v1940_v42 }
0x147c   :  { %3067 = verf.f32 %v1955_v26 }
0x147d   :  { %3069 = verf.f32 %v1954_v23 }
0x1482   :  { %v3064_v54 = vpop.eup %3063 }
0x1483   :  { %v3066_v31 = vpop.eup %3065  ;;  %v1961_v6 = vadd.f32 1.0, %v3064_v54 }
0x1484   :  { %v1960_v46 = vadd.f32 1.0, %v3066_v31 }
0x1485   :  { %v1965_v13 = vmul.f32 %v1961_v6, %v1949_v3 }
0x1486   :  { %v3068_v22 = vpop.eup %3067  ;;  %v1964_v37 = vmul.f32 %v1960_v46, %v1948_v8 }
0x1487   :  { %v3070_v35 = vpop.eup %3069  ;;  %v1963_v27 = vadd.f32 1.0, %v3068_v22 }
0x1488   :  { %v1962_v59 = vadd.f32 1.0, %v3070_v35  ;;  %2734 = vmatprep.mubr.msk.f32.mxu0 %vm390_vm2, %v1964_v37 }
0x1489   :  { %2735 = vmatmul.mubr.msk.f32.vlgmr.msra.gmra.mrb[30].mxu0 %vm390_vm2, %v1965_v13  ;;  %v1967_v41 = vmul.f32 %v1963_v27, %v1951_v43 }
0x148a   :  { %v1966_v39 = vmul.f32 %v1962_v59, %v1950_v14  ;;  %2917 = vmatpush3.bf16.msra.mxu0 %v2914_v2 }
0x148b   :  { %2919 = vmatprep.subr.bf16.mxu0 %v2918_v30 }
0x148c   :  { %2737 = vmatprep.mubr.msk.f32.mxu0 %vm390_vm2, %v1966_v39 }
0x148d   :  { %2738 = vmatmul.mubr.msk.f32.gmra.mrb[32].mxu0 %vm390_vm2, %v1967_v41 }
0x148e   :  { %2921 = vmatpush3.bf16.msra.mxu0 %v2918_v30 }
0x155c   :  { %v2736_v38 = vpop.f32.mrb[30].mxu0 }
0x155d   :  { %v2082_v47 = vpop.f32.mrb[31].mxu0  ;;  %v2088_v58 = vadd.f32 %v2736_v38, %v2354_v44 }
0x155e   :  { %v2083_v55 = vadd.f32 %v2354_v44, %v2082_v47 }
0x155f   :  { %v2102_v10 = vadd.f32 %v2088_v58, %v3599_v7 }
0x1560   :  { %v2739_v49 = vpop.f32.mrb[32].mxu0  ;;  %v2101_v62 = vadd.f32 %v2083_v55, %v3597_v63 }
0x1561   :  { %v2098_v45 = vadd.f32 %v2739_v49, %v2354_v44  ;;  %v2092_v52 = vpop.f32.mrb[33].mxu0  ;;  %v2108_v16 = vsel %vm200_vm1, %v2102_v10, 0.0 }
0x1562   :  { %v2093_v60 = vadd.f32 %v2354_v44, %v2092_v52  ;;  %v2105_v51 = vsel %vm200_vm1, %v2101_v62, 0.0 }
0x1563   :  { %v2104_v5 = vadd.f32 %v2098_v45, %v3607_v57 }
0x1564   :  { %v2103_v1 = vadd.f32 %v2093_v60, %v3605_v11 }
0x1565   :  { %v2114_v33 = vsel %vm200_vm1, %v2104_v5, 0.0 }
0x1566   :  { %2115 = vadd.xlane.f32.xlu0 %v2114_v33  ;;  %v2111_v0 = vsel %vm200_vm1, %v2103_v1, 0.0 }
0x1567   :  { %2112 = vadd.xlane.f32.xlu1 %v2111_v0 }
0x156a   :  { %2106 = vadd.xlane.f32.xlu0 %v2105_v51 }
0x156b   :  { %2109 = vadd.xlane.f32.xlu1 %v2108_v16 }
0x15f3   :  { %v2116_v21 = vpop.xlane.xlu0 %2115 }
0x15f4   :  { %v2120_v57 = vmul.f32 0.03125, %v2116_v21  ;;  %v2113_v17 = vpop.xlane.xlu1 %2112 }
0x15f5   :  { %v2119_v11 = vmul.f32 0.03125, %v2113_v17 }
0x15f6   :  { %v2124_v20 = vsub.f32 %v2104_v5, %v2120_v57  ;;  %v2359_v5 = vld [vmem:[#allocation5 + $0x50] ss:$0 sm:$0xff] }
0x15f7   :  { %v2123_v63 = vsub.f32 %v2103_v1, %v2119_v11  ;;  %v2107_v15 = vpop.xlane.xlu0 %2106 }
0x15f8   :  { %v2128_v18 = vmul.f32 %v2124_v20, %v2124_v20  ;;  %v2110_v36 = vpop.xlane.xlu1 %2109  ;;  %v2117_v28 = vmul.f32 0.03125, %v2107_v15 }
0x15f9   :  { %v2127_v53 = vmul.f32 %v2123_v63, %v2123_v63  ;;  %v2118_v32 = vmul.f32 0.03125, %v2110_v36 }
0x15fa   :  { %v2138_v7 = vsel %vm200_vm1, %v2128_v18, 0.0  ;;  %v2121_v25 = vsub.f32 %v2101_v62, %v2117_v28 }
0x15fb   :  { %2139 = vadd.xlane.f32.xlu1 %v2138_v7  ;;  %v2135_v19 = vsel %vm200_vm1, %v2127_v53, 0.0  ;;  %v2122_v50 = vsub.f32 %v2102_v10, %v2118_v32 }
0x15fc   :  { %2136 = vadd.xlane.f32.xlu0 %v2135_v19  ;;  %v2125_v48 = vmul.f32 %v2121_v25, %v2121_v25 }
0x15fd   :  { %v2126_v29 = vmul.f32 %v2122_v50, %v2122_v50 }
0x15fe   :  { %v2129_v34 = vsel %vm200_vm1, %v2125_v48, 0.0 }
0x15ff   :  { %v2132_v9 = vsel %vm200_vm1, %v2126_v29, 0.0 }
0x160c   :  { %2165 = vrot.lane.b32.xlu1 %v2354_v44, %s3158_s7 }
0x1612   :  { %2158 = vrot.lane.b32.xlu0 %v2354_v44, %s3157_s1 }
0x1630   :  { %2130 = vadd.xlane.f32.xlu1 %v2129_v34 }
0x1631   :  { %2133 = vadd.xlane.f32.xlu0 %v2132_v9 }
0x1688   :  { %v2140_v12 = vpop.xlane.xlu1 %2139 }
0x1689   :  { %v2144_v40 = vmul.f32 0.03125, %v2140_v12  ;;  %v2137_v42 = vpop.xlane.xlu0 %2136 }
0x168a   :  { %v2143_v26 = vmul.f32 0.03125, %v2137_v42 }
0x168b   :  { %v2148_v23 = vadd.f32 1e-05, %v2144_v40 }
0x168c   :  { %v2147_v54 = vadd.f32 1e-05, %v2143_v26  ;;  %v2166_v37 = vpop.permute.xlu1 %2165 }
0x168d   :  { %3071 = vrsqrt.f32 %v2148_v23  ;;  %v2159_v6 = vpop.permute.xlu0 %2158 }
0x168e   :  { %3073 = vrsqrt.f32 %v2147_v54 }
0x1697   :  { %v3072_v31 = vpop.eup %3071 }
0x1698   :  { %v3074_v8 = vpop.eup %3073  ;;  %v2156_v46 = vmul.f32 %v3072_v31, %v2124_v20 }
0x1699   :  { %v2155_v3 = vmul.f32 %v3074_v8, %v2123_v63 }
0x169a   :  { %v2164_v22 = vmul.f32 %v2159_v6, %v2156_v46 }
0x169b   :  { %v2163_v35 = vmul.f32 %v2159_v6, %v2155_v3 }
0x169c   :  { %v2171_v27 = vadd.f32 %v2166_v37, %v2164_v22 }
0x169d   :  { %v2170_v13 = vadd.f32 %v2166_v37, %v2163_v35 }
0x169f   :  { %2751 = vmatprep.mubr.msk.f32.mxu1 %vm200_vm1, %v2170_v13 }
0x16a0   :  { %2752 = vmatmul.mubr.msk.f32.vlgmr.msra.gmra.mrb[16].mxu1 %vm200_vm1, %v2171_v27 }
0x16bd   :  { %v2131_v14 = vpop.xlane.xlu1 %2130 }
0x16be   :  { %v2141_v59 = vmul.f32 0.03125, %v2131_v14  ;;  %v2134_v43 = vpop.xlane.xlu0 %2133 }
0x16bf   :  { %v2142_v39 = vmul.f32 0.03125, %v2134_v43 }
0x16c0   :  { %v2145_v41 = vadd.f32 1e-05, %v2141_v59 }
0x16c1   :  { %v2146_v38 = vadd.f32 1e-05, %v2142_v39 }
0x16c2   :  { %3075 = vrsqrt.f32 %v2145_v41 }
0x16c3   :  { %3077 = vrsqrt.f32 %v2146_v38 }
0x16cc   :  { %v3076_v47 = vpop.eup %3075 }
0x16cd   :  { %v3078_v44 = vpop.eup %3077  ;;  %v2153_v49 = vmul.f32 %v3076_v47, %v2121_v25 }
0x16ce   :  { %v2154_v55 = vmul.f32 %v3078_v44, %v2122_v50 }
0x16cf   :  { %v2161_v45 = vmul.f32 %v2159_v6, %v2153_v49 }
0x16d0   :  { %v2162_v52 = vmul.f32 %v2159_v6, %v2154_v55 }
0x16d1   :  { %v2168_v58 = vadd.f32 %v2166_v37, %v2161_v45 }
0x16d2   :  { %v2169_v60 = vadd.f32 %v2166_v37, %v2162_v52 }
0x16d3   :  { %2748 = vmatprep.mubr.msk.f32.mxu0 %vm200_vm1, %v2168_v58 }
0x16d4   :  { %2749 = vmatmul.mubr.msk.f32.vlgmr.msra.gmra.mrb[34].mxu0 %vm200_vm1, %v2169_v60 }
0x1773   :  { %v2753_v1 = vpop.f32.mrb[16].mxu1 }
0x1774   :  { %v2275_v62 = vadd.f32 %v2753_v1, %v2359_v5  ;;  %v2269_v33 = vpop.f32.mrb[17].mxu1 }
0x1775   :  { %v2270_v10 = vadd.f32 %v2359_v5, %v2269_v33 }
0x1776   :  { %2282 = vrot.lane.b32.xlu1 %v2275_v62, %s3158_s7 }
0x1777   :  { %2280 = vrot.lane.b32.xlu0 %v2270_v10, %s3158_s7 }
0x17a7   :  { %v2750_v0 = vpop.f32.mrb[34].mxu0 }
0x17a8   :  { %v2265_v51 = vadd.f32 %v2750_v0, %v2359_v5  ;;  %v2259_v16 = vpop.f32.mrb[35].mxu0 }
0x17a9   :  { %v2260_v21 = vadd.f32 %v2359_v5, %v2259_v16 }
0x17e8   :  { %v2283_v57 = vpop.permute.xlu1 %2282 }
0x17e9   :  { %v2287_v17 = vsel %vm390_vm2, %v2265_v51, %v2283_v57  ;;  %v2281_v11 = vpop.permute.xlu0 %2280 }
0x17ea   :  { %2289 = vst [vmem:[#allocation7 + $0x8] sm:$0xff] %v2287_v17  ;;  %v2286_v20 = vsel %vm390_vm2, %v2260_v21, %v2281_v11 }
0x17eb   :  { %2288 = vst [vmem:[#allocation7] sm:$0xff] %v2286_v20 }
0x17ec   :  { %3134 = shalt.err (!%p3131_p6)
}
0x17ed   :  { %s3135_s14 = scalar_lea.hbm %s3656_s2, 256 }
0x17ee   :  { %p3136_p7 = scmp.ne.s32.totalorder %s3656_s2, %s3135_s14  ;;  %p3139_p8 = scmp.lt.u32.totalorder %s3135_s14, %s3656_s2 }
0x17f0   :  { %p3141_p9 = pnand %p3139_p8, %p3136_p7 }
0x17f2   :  { %3144 = shalt.err (!%p3141_p9)
}
0x17f3   :  { %2301 = dma.vmem_to_hbm [thread:$0]  %s2296_s10, 256, %s3656_s2, [#allocation4], %s3153_s0, %s3153_s0, %s3154_s4  }
0x17f4   :  { %3149 = dma.done.wait [#allocation4], 256  }
0x17f5   :  { %3150 = vsyncadd [#allocation4], 4294967040 }
0x17f6   :  { %2305 = vsyncpa [#allocation3], 1 }
0x17f7   :  { %2306 = vsyncpa [#allocation6], 1 }
0x17f8   :  { %2307 = vsyncpa [#allocation4], 1 }

</bundles_post_ra>
